<compile_context>
chip_gen: v7x
topology: tpu7x:2x2x1
jax: 0.10.0
libtpu: 0.0.40
codegen_flags: <defaults>
</compile_context>

<pallas_src>
import numpy as np
import jax
import jax.numpy as jnp
from jax.experimental import pallas as pl
from jax.experimental.pallas import tpu as pltpu

WIDTH = 128
DEPTH = 4
SKIP = (1,)
SIGMA = 1.0
INIT_RANGE = 0.1
TILE_ROWS = 2048          # sweep 1024 / 2048 / 4096 for very large R


def _round_up(x, m):
    return (x + m - 1) // m * m


def _make_kernel(sigma, width):
    inv2s2 = 0.5 / (sigma * sigma)
    W = width

    def kernel(xin_ref,
               w_in_ref, b_in_ref,
               w02_ref, b0_ref,
               w1_ref, b1_ref,
               w2b_ref, b2_ref,
               w3_ref, b3_ref,
               wh_ref, bh_ref,
               wv_ref, bv_ref,
               wr_ref, br_ref,
               out_ref):

        def dot(a, w_ref):
            # bf16 MXU matmul with f32 accumulation (no-op cast if already bf16).
            return jnp.dot(a.astype(jnp.bfloat16), w_ref[...],
                           preferred_element_type=jnp.float32)

        def gauss(x):
            # Square in f32, exp argument/result in bf16: bf16 EUP on v6e/v7x,
            # bf16 result feeds the next dot without an extra cast.
            arg = (x * x) * (-inv2s2)
            return jnp.exp(arg.astype(jnp.bfloat16))

        # ---- fused gaussian_init_d / gaussian_init_c (one K=8 f32 matmul) ----
        x = xin_ref[...]                                    # [T, 8] (pts | ray | 0)
        enc = jnp.dot(x, w_in_ref[...],
                      preferred_element_type=jnp.float32) + b_in_ref[...]  # [T, 2W]
        xd = enc[:, :W]                                     # pts branch
        xc = enc[:, W:]                                     # ray branch
        mu_d = jnp.mean(xd, axis=-1, keepdims=True)
        mu_c = jnp.mean(xc, axis=-1, keepdims=True)
        points_enc = gauss(mu_d - xd)                       # [T, W]  bf16
        ray_enc = gauss(mu_c - xc)                          # [T, W]  bf16

        # ---- trunk: layer 0 and the skip contribution share LHS -> one N=2W dot
        pe2 = dot(points_enc, w02_ref)                      # [T, 2W] f32
        skip_part = pe2[:, W:]                              # points_enc @ w2[:W]
        feat = gauss(pe2[:, :W] + b0_ref[...])              # layer 0
        feat = gauss(dot(feat, w1_ref) + b1_ref[...])       # layer 1
        feat = gauss(dot(feat, w2b_ref) + skip_part + b2_ref[...])  # layer 2 (skip)
        feat = gauss(dot(feat, w3_ref) + b3_ref[...])       # layer 3

        # ---- fused feature / alpha head: [W, W+8] matmul ----
        head = dot(feat, wh_ref) + bh_ref[...]              # [T, W+8]
        feature = head[:, :W]                               # feature_linear output
        alpha = head[:, W:W + 1]                            # alpha_linear output

        # ---- views_linears[0]: one K=2W matmul on [feature | ray_enc] ----
        hin = jnp.concatenate([feature.astype(jnp.bfloat16), ray_enc], axis=-1)
        h = gauss(jnp.dot(hin, wv_ref[...],
                          preferred_element_type=jnp.float32) + bv_ref[...])

        # ---- rgb head (N padded to 8) + density ----
        rgb8 = jax.nn.sigmoid(dot(h, wr_ref) + br_ref[...])    # [T, 8]
        density = jnp.maximum(alpha, 0.0)                        # relu, [T, 1]

        # Lane-slice stores: rgb in lanes 0-2, density in lane 3 (lanes 4-7 unused).
        out_ref[:, 0:3] = rgb8[:, 0:3].astype(out_ref.dtype)
        out_ref[:, 3:4] = density.astype(out_ref.dtype)

    return kernel


def init_params(key, width=WIDTH, rng=INIT_RANGE):
    """Deterministic synthetic parameters (uniform in [-rng, rng]), original layout."""
    names_shapes = [
        ("wd", (3, width)), ("bd", (1, width)),             # gaussian_linear_d
        ("wc", (3, width)), ("bc", (1, width)),             # gaussian_linear_c
        ("w0", (width, width)), ("b0", (1, width)),
        ("w1", (width, width)), ("b1", (1, width)),
        ("w2", (2 * width, width)), ("b2", (1, width)),     # layer after skip sees 2W
        ("w3", (width, width)), ("b3", (1, width)),
        ("wf", (width, width)), ("bf", (1, width)),         # feature_linear
        ("wa", (width, 1)), ("ba", (1, 1)),                 # alpha_linear
        ("wv", (2 * width, width // 2)), ("bv", (1, width // 2)),  # views_linears[0]
        ("wr", (width // 2, 3)), ("br", (1, 3)),            # rgb_linear
    ]
    params = {}
    keys = jax.random.split(key, len(names_shapes))
    for k, (name, shape) in zip(keys, names_shapes):
        params[name] = jax.random.uniform(k, shape, jnp.float32, -rng, rng)
    return params


def pack_params(p, width=WIDTH):
    """Fuse / split / cast weights for the optimized kernel layout."""
    W = width
    bf = jnp.bfloat16

    # block-diagonal fused input-encoding weight: [8, 2W] (kept f32 for accuracy)
    w_in = jnp.zeros((8, 2 * W), jnp.float32)
    w_in = w_in.at[0:3, :W].set(p["wd"])
    w_in = w_in.at[3:6, W:].set(p["wc"])
    b_in = jnp.concatenate([p["bd"], p["bc"]], axis=-1)        # [1, 2W]

    # merged layer-0 + skip-branch weight (shared LHS = points_enc): [W, 2W]
    w02 = jnp.concatenate([p["w0"], p["w2"][:W]], axis=-1)

    # fused feature+alpha head: [W, W+8] (cols 0:W = wf, col W = wa, rest 0)
    wh = jnp.zeros((W, W + 8), jnp.float32)
    wh = wh.at[:, :W].set(p["wf"])
    wh = wh.at[:, W:W + 1].set(p["wa"])
    bh = jnp.zeros((1, W + 8), jnp.float32)
    bh = bh.at[:, :W].set(p["bf"])
    bh = bh.at[:, W:W + 1].set(p["ba"])

    # rgb head padded to N=8
    wr8 = jnp.zeros((W // 2, 8), jnp.float32).at[:, :3].set(p["wr"])
    br8 = jnp.zeros((1, 8), jnp.float32).at[:, :3].set(p["br"])

    packed = [
        w_in, b_in,                       # f32
        w02.astype(bf), p["b0"],
        p["w1"].astype(bf), p["b1"],
        p["w2"][W:].astype(bf), p["b2"],  # feat rows of the skip layer
        p["w3"].astype(bf), p["b3"],
        wh.astype(bf), bh,
        p["wv"].astype(bf), p["bv"],      # full [2W, W//2] for fused views matmul
        wr8.astype(bf), br8,
    ]
    return packed


def nerf_gaussian_forward(points_3D, ray_unit, params,
                          sigma=SIGMA, width=WIDTH, tile_rows=TILE_ROWS):
    lead_shape = points_3D.shape[:-1]
    R = int(np.prod(lead_shape))

    # Tile selection: large tiles for overhead amortization, but guarantee
    # >=2 grid steps when possible so both v7x TensorCores are used.
    R128 = _round_up(max(R, 1), 128)
    if R128 >= 2 * tile_rows:
        tr = tile_rows
    elif R128 >= 256:
        tr = _round_up((R128 + 1) // 2, 128)
    else:
        tr = R128
    R_pad = _round_up(R128, tr)

    pts = points_3D.reshape(R, 3).astype(jnp.float32)
    ray = ray_unit.reshape(R, 3).astype(jnp.float32)
    # Packed [R_pad, 8] input: lanes 0-2 = pts, 3-5 = ray, 6-7 = 0.
    xin = jnp.concatenate([pts, ray, jnp.zeros((R, 2), jnp.float32)], axis=-1)
    if R_pad != R:
        xin = jnp.pad(xin, ((0, R_pad - R), (0, 0)))

    packed = pack_params(params, width)

    in_specs = [pl.BlockSpec((tr, 8), lambda i: (i, 0))] + [
        pl.BlockSpec(w.shape, lambda i: (0, 0)) for w in packed]
    out_specs = pl.BlockSpec((tr, 8), lambda i: (i, 0))
    out_shape = jax.ShapeDtypeStruct((R_pad, 8), jnp.float32)

    W = width
    flops_per_row = 2 * (8 * 2 * W            # fused input encoding
                         + W * 2 * W          # merged layer 0 + skip contribution
                         + W * W              # layer 1
                         + W * W              # layer 2 (feat part)
                         + W * W              # layer 3
                         + W * (W + 8)        # fused feature+alpha head
                         + 2 * W * (W // 2)   # views layer (K=2W)
                         + (W // 2) * 8)      # rgb head (padded)
    transcendentals_per_row = 2 * W + DEPTH * W + W // 2 + 8
    weight_bytes = sum(int(np.prod(w.shape)) * w.dtype.itemsize for w in packed)
    cost = pl.CostEstimate(
        flops=int(flops_per_row * R_pad),
        transcendentals=int(transcendentals_per_row * R_pad),
        bytes_accessed=int(R_pad * (8 * 4 + 8 * 4) + weight_bytes))

    kernel = _make_kernel(sigma, width)

    out = pl.pallas_call(
        kernel,
        out_shape=out_shape,
        grid=(R_pad // tr,),
        in_specs=in_specs,
        out_specs=out_specs,
        compiler_params=pltpu.CompilerParams(
            dimension_semantics=("parallel",),
            vmem_limit_bytes=48 * 1024 * 1024),
        cost_estimate=cost,
    )(xin, *packed)

    rgb = out[:R, :3].reshape(*lead_shape, 3)
    density = out[:R, 3].reshape(*lead_shape)
    return rgb, density


def ref_forward(points_3D, ray_unit, p, sigma=SIGMA, skip=SKIP):
    """Pure-JAX f32 reference mirroring the PyTorch forward."""
    def gauss(x):
        return jnp.exp(-0.5 * x * x / sigma ** 2)

    xd = points_3D @ p["wd"] + p["bd"][0]
    mu = xd.mean(-1, keepdims=True)
    feat = jnp.exp(-0.5 * (mu - xd) ** 2 / sigma ** 2)
    points_enc = feat
    ws = [p["w0"], p["w1"], p["w2"], p["w3"]]
    bs = [p["b0"], p["b1"], p["b2"], p["b3"]]
    for i in range(DEPTH):
        feat = gauss(feat @ ws[i] + bs[i][0])
        if i in skip:
            feat = jnp.concatenate([points_enc, feat], -1)
    alpha = feat @ p["wa"] + p["ba"][0]
    feature = feat @ p["wf"] + p["bf"][0]
    xc = ray_unit @ p["wc"] + p["bc"][0]
    muc = xc.mean(-1, keepdims=True)
    ray_enc = jnp.exp(-0.5 * (muc - xc) ** 2 / sigma ** 2)
    h = jnp.concatenate([feature, ray_enc], -1)
    h = gauss(h @ p["wv"] + p["bv"][0])
    rgb = jax.nn.sigmoid(h @ p["wr"] + p["br"][0])
    density = jnp.maximum(alpha, 0.0)
    return rgb, density[..., 0]


if __name__ == "__main__":
    key = jax.random.PRNGKey(0)
    k_pts, k_ray, k_par = jax.random.split(key, 3)

    # [batch, rays, samples, 3] -> flattens to 256 rows (2 grid steps of 128)
    B, NR, NS = 2, 16, 8
    points_3D = jax.random.normal(k_pts, (B, NR, NS, 3), jnp.float32)
    ray = jax.random.normal(k_ray, (B, NR, NS, 3), jnp.float32)
    ray_unit = ray / jnp.linalg.norm(ray, axis=-1, keepdims=True)

    params = init_params(k_par)

    rgb, density = nerf_gaussian_forward(points_3D, ray_unit, params)
    jax.block_until_ready((rgb, density))

    rgb_ref, dens_ref = ref_forward(points_3D, ray_unit, params)
    assert rgb.shape == (B, NR, NS, 3) and density.shape == (B, NR, NS)
    # bf16 MXU inputs / bf16 Gaussian exp with f32 accumulation -> relaxed tolerances.
    np.testing.assert_allclose(np.asarray(rgb), np.asarray(rgb_ref),
                               rtol=5e-2, atol=5e-2)
    np.testing.assert_allclose(np.asarray(density), np.asarray(dens_ref),
                               rtol=5e-2, atol=5e-2)
    print("KERNEL_OK")
</pallas_src>

<mosaic_0001>
module attributes {stable_mosaic.version = 11 : i64} {
  func.func @kernel(%arg0: i32, %arg1: memref<128x8xf32, #tpu.memory_space<vmem>>, %arg2: memref<8x256xf32, #tpu.memory_space<vmem>>, %arg3: memref<1x256xf32, #tpu.memory_space<vmem>>, %arg4: memref<128x256xbf16, #tpu.memory_space<vmem>>, %arg5: memref<1x128xf32, #tpu.memory_space<vmem>>, %arg6: memref<128x128xbf16, #tpu.memory_space<vmem>>, %arg7: memref<1x128xf32, #tpu.memory_space<vmem>>, %arg8: memref<128x128xbf16, #tpu.memory_space<vmem>>, %arg9: memref<1x128xf32, #tpu.memory_space<vmem>>, %arg10: memref<128x128xbf16, #tpu.memory_space<vmem>>, %arg11: memref<1x128xf32, #tpu.memory_space<vmem>>, %arg12: memref<128x136xbf16, #tpu.memory_space<vmem>>, %arg13: memref<1x136xf32, #tpu.memory_space<vmem>>, %arg14: memref<256x64xbf16, #tpu.memory_space<vmem>>, %arg15: memref<1x64xf32, #tpu.memory_space<vmem>>, %arg16: memref<64x8xbf16, #tpu.memory_space<vmem>>, %arg17: memref<1x8xf32, #tpu.memory_space<vmem>>, %arg18: memref<128x8xf32, #tpu.memory_space<vmem>>) attributes {dimension_semantics = [#tpu.dimension_semantics<parallel>], iteration_bounds = array<i64: 2>, scalar_prefetch = 0 : i64, scratch_operands = 0 : i64, tpu.core_type = #tpu.core_type<tc>, window_params = [{transform_indices = @transform_0, window_bounds = array<i64: 128, 8>}, {pipeline_mode = #tpu.pipeline_mode<synchronous>, transform_indices = @transform_1, window_bounds = array<i64: 8, 256>}, {pipeline_mode = #tpu.pipeline_mode<synchronous>, transform_indices = @transform_2, window_bounds = array<i64: 1, 256>}, {pipeline_mode = #tpu.pipeline_mode<synchronous>, transform_indices = @transform_3, window_bounds = array<i64: 128, 256>}, {pipeline_mode = #tpu.pipeline_mode<synchronous>, transform_indices = @transform_4, window_bounds = array<i64: 1, 128>}, {pipeline_mode = #tpu.pipeline_mode<synchronous>, transform_indices = @transform_5, window_bounds = array<i64: 128, 128>}, {pipeline_mode = #tpu.pipeline_mode<synchronous>, transform_indices = @transform_6, window_bounds = array<i64: 1, 128>}, {pipeline_mode = #tpu.pipeline_mode<synchronous>, transform_indices = @transform_7, window_bounds = array<i64: 128, 128>}, {pipeline_mode = #tpu.pipeline_mode<synchronous>, transform_indices = @transform_8, window_bounds = array<i64: 1, 128>}, {pipeline_mode = #tpu.pipeline_mode<synchronous>, transform_indices = @transform_9, window_bounds = array<i64: 128, 128>}, {pipeline_mode = #tpu.pipeline_mode<synchronous>, transform_indices = @transform_10, window_bounds = array<i64: 1, 128>}, {pipeline_mode = #tpu.pipeline_mode<synchronous>, transform_indices = @transform_11, window_bounds = array<i64: 128, 136>}, {pipeline_mode = #tpu.pipeline_mode<synchronous>, transform_indices = @transform_12, window_bounds = array<i64: 1, 136>}, {pipeline_mode = #tpu.pipeline_mode<synchronous>, transform_indices = @transform_13, window_bounds = array<i64: 256, 64>}, {pipeline_mode = #tpu.pipeline_mode<synchronous>, transform_indices = @transform_14, window_bounds = array<i64: 1, 64>}, {pipeline_mode = #tpu.pipeline_mode<synchronous>, transform_indices = @transform_15, window_bounds = array<i64: 64, 8>}, {pipeline_mode = #tpu.pipeline_mode<synchronous>, transform_indices = @transform_16, window_bounds = array<i64: 1, 8>}, {transform_indices = @transform_17, window_bounds = array<i64: 128, 8>}]} {
    %c0 = arith.constant 0 : index
    %c0_0 = arith.constant 0 : index
    %0 = vector.load %arg1[%c0, %c0_0] : memref<128x8xf32, #tpu.memory_space<vmem>>, vector<128x8xf32>
    %c0_1 = arith.constant 0 : index
    %c0_2 = arith.constant 0 : index
    %1 = vector.load %arg2[%c0_1, %c0_2] : memref<8x256xf32, #tpu.memory_space<vmem>>, vector<8x256xf32>
    %cst = arith.constant dense<0.000000e+00> : vector<128x256xf32>
    %2 = tpu.matmul %0, %1, %cst {dimension_numbers = #tpu.dot_dimension_numbers<[1], [0], [0], [1], [0, 0, 1, 1], [], []>} : vector<128x8xf32>, vector<8x256xf32>, vector<128x256xf32> -> vector<128x256xf32>
    %c0_3 = arith.constant 0 : index
    %c0_4 = arith.constant 0 : index
    %3 = vector.load %arg3[%c0_3, %c0_4] : memref<1x256xf32, #tpu.memory_space<vmem>>, vector<1x256xf32>
    %4 = vector.broadcast %3 : vector<1x256xf32> to vector<128x256xf32>
    %5 = arith.addf %2, %4 : vector<128x256xf32>
    %6 = vector.extract_strided_slice %5 {offsets = [0, 0], sizes = [128, 128], strides = [1, 1]} : vector<128x256xf32> to vector<128x128xf32>
    %7 = vector.extract_strided_slice %5 {offsets = [0, 128], sizes = [128, 128], strides = [1, 1]} : vector<128x256xf32> to vector<128x128xf32>
    %cst_5 = arith.constant dense<0.000000e+00> : vector<128xf32>
    %8 = vector.multi_reduction <add>, %6, %cst_5 [1] : vector<128x128xf32> to vector<128xf32>
    %9 = vector.shape_cast %8 : vector<128xf32> to vector<128x1xf32>
    %cst_6 = arith.constant 1.280000e+02 : f32
    %10 = vector.broadcast %cst_6 : f32 to vector<128x1xf32>
    %11 = arith.divf %9, %10 : vector<128x1xf32>
    %cst_7 = arith.constant dense<0.000000e+00> : vector<128xf32>
    %12 = vector.multi_reduction <add>, %7, %cst_7 [1] : vector<128x128xf32> to vector<128xf32>
    %13 = vector.shape_cast %12 : vector<128xf32> to vector<128x1xf32>
    %cst_8 = arith.constant 1.280000e+02 : f32
    %14 = vector.broadcast %cst_8 : f32 to vector<128x1xf32>
    %15 = arith.divf %13, %14 : vector<128x1xf32>
    %16 = vector.broadcast %11 : vector<128x1xf32> to vector<128x128xf32>
    %17 = arith.subf %16, %6 : vector<128x128xf32>
    %18 = arith.mulf %17, %17 : vector<128x128xf32>
    %cst_9 = arith.constant -5.000000e-01 : f32
    %19 = vector.broadcast %cst_9 : f32 to vector<128x128xf32>
    %20 = arith.mulf %18, %19 : vector<128x128xf32>
    %21 = arith.truncf %20 : vector<128x128xf32> to vector<128x128xbf16>
    %22 = math.exp %21 : vector<128x128xbf16>
    %23 = vector.broadcast %15 : vector<128x1xf32> to vector<128x128xf32>
    %24 = arith.subf %23, %7 : vector<128x128xf32>
    %25 = arith.mulf %24, %24 : vector<128x128xf32>
    %cst_10 = arith.constant -5.000000e-01 : f32
    %26 = vector.broadcast %cst_10 : f32 to vector<128x128xf32>
    %27 = arith.mulf %25, %26 : vector<128x128xf32>
    %28 = arith.truncf %27 : vector<128x128xf32> to vector<128x128xbf16>
    %29 = math.exp %28 : vector<128x128xbf16>
    %c0_11 = arith.constant 0 : index
    %c0_12 = arith.constant 0 : index
    %30 = vector.load %arg4[%c0_11, %c0_12] : memref<128x256xbf16, #tpu.memory_space<vmem>>, vector<128x256xbf16>
    %cst_13 = arith.constant dense<0.000000e+00> : vector<128x256xf32>
    %31 = tpu.matmul %22, %30, %cst_13 {dimension_numbers = #tpu.dot_dimension_numbers<[1], [0], [0], [1], [0, 0, 1, 1], [], []>} : vector<128x128xbf16>, vector<128x256xbf16>, vector<128x256xf32> -> vector<128x256xf32>
    %32 = vector.extract_strided_slice %31 {offsets = [0, 128], sizes = [128, 128], strides = [1, 1]} : vector<128x256xf32> to vector<128x128xf32>
    %33 = vector.extract_strided_slice %31 {offsets = [0, 0], sizes = [128, 128], strides = [1, 1]} : vector<128x256xf32> to vector<128x128xf32>
    %c0_14 = arith.constant 0 : index
    %c0_15 = arith.constant 0 : index
    %34 = vector.load %arg5[%c0_14, %c0_15] : memref<1x128xf32, #tpu.memory_space<vmem>>, vector<1x128xf32>
    %35 = vector.broadcast %34 : vector<1x128xf32> to vector<128x128xf32>
    %36 = arith.addf %33, %35 : vector<128x128xf32>
    %37 = arith.mulf %36, %36 : vector<128x128xf32>
    %cst_16 = arith.constant -5.000000e-01 : f32
    %38 = vector.broadcast %cst_16 : f32 to vector<128x128xf32>
    %39 = arith.mulf %37, %38 : vector<128x128xf32>
    %40 = arith.truncf %39 : vector<128x128xf32> to vector<128x128xbf16>
    %41 = math.exp %40 : vector<128x128xbf16>
    %c0_17 = arith.constant 0 : index
    %c0_18 = arith.constant 0 : index
    %42 = vector.load %arg6[%c0_17, %c0_18] : memref<128x128xbf16, #tpu.memory_space<vmem>>, vector<128x128xbf16>
    %cst_19 = arith.constant dense<0.000000e+00> : vector<128x128xf32>
    %43 = tpu.matmul %41, %42, %cst_19 {dimension_numbers = #tpu.dot_dimension_numbers<[1], [0], [0], [1], [0, 0, 1, 1], [], []>} : vector<128x128xbf16>, vector<128x128xbf16>, vector<128x128xf32> -> vector<128x128xf32>
    %c0_20 = arith.constant 0 : index
    %c0_21 = arith.constant 0 : index
    %44 = vector.load %arg7[%c0_20, %c0_21] : memref<1x128xf32, #tpu.memory_space<vmem>>, vector<1x128xf32>
    %45 = vector.broadcast %44 : vector<1x128xf32> to vector<128x128xf32>
    %46 = arith.addf %43, %45 : vector<128x128xf32>
    %47 = arith.mulf %46, %46 : vector<128x128xf32>
    %cst_22 = arith.constant -5.000000e-01 : f32
    %48 = vector.broadcast %cst_22 : f32 to vector<128x128xf32>
    %49 = arith.mulf %47, %48 : vector<128x128xf32>
    %50 = arith.truncf %49 : vector<128x128xf32> to vector<128x128xbf16>
    %51 = math.exp %50 : vector<128x128xbf16>
    %c0_23 = arith.constant 0 : index
    %c0_24 = arith.constant 0 : index
    %52 = vector.load %arg8[%c0_23, %c0_24] : memref<128x128xbf16, #tpu.memory_space<vmem>>, vector<128x128xbf16>
    %cst_25 = arith.constant dense<0.000000e+00> : vector<128x128xf32>
    %53 = tpu.matmul %51, %52, %cst_25 {dimension_numbers = #tpu.dot_dimension_numbers<[1], [0], [0], [1], [0, 0, 1, 1], [], []>} : vector<128x128xbf16>, vector<128x128xbf16>, vector<128x128xf32> -> vector<128x128xf32>
    %54 = arith.addf %53, %32 : vector<128x128xf32>
    %c0_26 = arith.constant 0 : index
    %c0_27 = arith.constant 0 : index
    %55 = vector.load %arg9[%c0_26, %c0_27] : memref<1x128xf32, #tpu.memory_space<vmem>>, vector<1x128xf32>
    %56 = vector.broadcast %55 : vector<1x128xf32> to vector<128x128xf32>
    %57 = arith.addf %54, %56 : vector<128x128xf32>
    %58 = arith.mulf %57, %57 : vector<128x128xf32>
    %cst_28 = arith.constant -5.000000e-01 : f32
    %59 = vector.broadcast %cst_28 : f32 to vector<128x128xf32>
    %60 = arith.mulf %58, %59 : vector<128x128xf32>
    %61 = arith.truncf %60 : vector<128x128xf32> to vector<128x128xbf16>
    %62 = math.exp %61 : vector<128x128xbf16>
    %c0_29 = arith.constant 0 : index
    %c0_30 = arith.constant 0 : index
    %63 = vector.load %arg10[%c0_29, %c0_30] : memref<128x128xbf16, #tpu.memory_space<vmem>>, vector<128x128xbf16>
    %cst_31 = arith.constant dense<0.000000e+00> : vector<128x128xf32>
    %64 = tpu.matmul %62, %63, %cst_31 {dimension_numbers = #tpu.dot_dimension_numbers<[1], [0], [0], [1], [0, 0, 1, 1], [], []>} : vector<128x128xbf16>, vector<128x128xbf16>, vector<128x128xf32> -> vector<128x128xf32>
    %c0_32 = arith.constant 0 : index
    %c0_33 = arith.constant 0 : index
    %65 = vector.load %arg11[%c0_32, %c0_33] : memref<1x128xf32, #tpu.memory_space<vmem>>, vector<1x128xf32>
    %66 = vector.broadcast %65 : vector<1x128xf32> to vector<128x128xf32>
    %67 = arith.addf %64, %66 : vector<128x128xf32>
    %68 = arith.mulf %67, %67 : vector<128x128xf32>
    %cst_34 = arith.constant -5.000000e-01 : f32
    %69 = vector.broadcast %cst_34 : f32 to vector<128x128xf32>
    %70 = arith.mulf %68, %69 : vector<128x128xf32>
    %71 = arith.truncf %70 : vector<128x128xf32> to vector<128x128xbf16>
    %72 = math.exp %71 : vector<128x128xbf16>
    %c0_35 = arith.constant 0 : index
    %c0_36 = arith.constant 0 : index
    %73 = vector.load %arg12[%c0_35, %c0_36] : memref<128x136xbf16, #tpu.memory_space<vmem>>, vector<128x136xbf16>
    %cst_37 = arith.constant dense<0.000000e+00> : vector<128x136xf32>
    %74 = tpu.matmul %72, %73, %cst_37 {dimension_numbers = #tpu.dot_dimension_numbers<[1], [0], [0], [1], [0, 0, 1, 1], [], []>} : vector<128x128xbf16>, vector<128x136xbf16>, vector<128x136xf32> -> vector<128x136xf32>
    %c0_38 = arith.constant 0 : index
    %c0_39 = arith.constant 0 : index
    %75 = vector.load %arg13[%c0_38, %c0_39] : memref<1x136xf32, #tpu.memory_space<vmem>>, vector<1x136xf32>
    %76 = vector.broadcast %75 : vector<1x136xf32> to vector<128x136xf32>
    %77 = arith.addf %74, %76 : vector<128x136xf32>
    %78 = vector.extract_strided_slice %77 {offsets = [0, 0], sizes = [128, 128], strides = [1, 1]} : vector<128x136xf32> to vector<128x128xf32>
    %79 = vector.extract_strided_slice %77 {offsets = [0, 128], sizes = [128, 1], strides = [1, 1]} : vector<128x136xf32> to vector<128x1xf32>
    %80 = arith.truncf %78 : vector<128x128xf32> to vector<128x128xbf16>
    %81 = tpu.concatenate %80, %29 in 1 : vector<128x128xbf16>, vector<128x128xbf16> -> vector<128x256xbf16>
    %c0_40 = arith.constant 0 : index
    %c0_41 = arith.constant 0 : index
    %82 = vector.load %arg14[%c0_40, %c0_41] : memref<256x64xbf16, #tpu.memory_space<vmem>>, vector<256x64xbf16>
    %cst_42 = arith.constant dense<0.000000e+00> : vector<128x64xf32>
    %83 = tpu.matmul %81, %82, %cst_42 {dimension_numbers = #tpu.dot_dimension_numbers<[1], [0], [0], [1], [0, 0, 1, 1], [], []>} : vector<128x256xbf16>, vector<256x64xbf16>, vector<128x64xf32> -> vector<128x64xf32>
    %c0_43 = arith.constant 0 : index
    %c0_44 = arith.constant 0 : index
    %84 = vector.load %arg15[%c0_43, %c0_44] : memref<1x64xf32, #tpu.memory_space<vmem>>, vector<1x64xf32>
    %85 = vector.broadcast %84 : vector<1x64xf32> to vector<128x64xf32>
    %86 = arith.addf %83, %85 : vector<128x64xf32>
    %87 = arith.mulf %86, %86 : vector<128x64xf32>
    %cst_45 = arith.constant -5.000000e-01 : f32
    %88 = vector.broadcast %cst_45 : f32 to vector<128x64xf32>
    %89 = arith.mulf %87, %88 : vector<128x64xf32>
    %90 = arith.truncf %89 : vector<128x64xf32> to vector<128x64xbf16>
    %91 = math.exp %90 : vector<128x64xbf16>
    %c0_46 = arith.constant 0 : index
    %c0_47 = arith.constant 0 : index
    %92 = vector.load %arg16[%c0_46, %c0_47] : memref<64x8xbf16, #tpu.memory_space<vmem>>, vector<64x8xbf16>
    %cst_48 = arith.constant dense<0.000000e+00> : vector<128x8xf32>
    %93 = tpu.matmul %91, %92, %cst_48 {dimension_numbers = #tpu.dot_dimension_numbers<[1], [0], [0], [1], [0, 0, 1, 1], [], []>} : vector<128x64xbf16>, vector<64x8xbf16>, vector<128x8xf32> -> vector<128x8xf32>
    %c0_49 = arith.constant 0 : index
    %c0_50 = arith.constant 0 : index
    %94 = vector.load %arg17[%c0_49, %c0_50] : memref<1x8xf32, #tpu.memory_space<vmem>>, vector<1x8xf32>
    %95 = vector.broadcast %94 : vector<1x8xf32> to vector<128x8xf32>
    %96 = arith.addf %93, %95 : vector<128x8xf32>
    %97 = arith.negf %96 : vector<128x8xf32>
    %98 = math.exp %97 : vector<128x8xf32>
    %cst_51 = arith.constant 1.000000e+00 : f32
    %99 = vector.broadcast %cst_51 : f32 to vector<128x8xf32>
    %100 = arith.addf %99, %98 : vector<128x8xf32>
    %101 = arith.divf %99, %100 : vector<128x8xf32>
    %cst_52 = arith.constant 0.000000e+00 : f32
    %102 = vector.broadcast %cst_52 : f32 to vector<128x1xf32>
    %103 = arith.maximumf %79, %102 : vector<128x1xf32>
    %104 = vector.extract_strided_slice %101 {offsets = [0, 0], sizes = [128, 3], strides = [1, 1]} : vector<128x8xf32> to vector<128x3xf32>
    %c0_53 = arith.constant 0 : index
    %c0_54 = arith.constant 0 : index
    %105 = vector.load %arg18[%c0_53, %c0_54] : memref<128x8xf32, #tpu.memory_space<vmem>>, vector<128x3xf32>
    tpu.vector_store %arg18[%c0_53, %c0_54], %104 {strides = array<i32>} : memref<128x8xf32, #tpu.memory_space<vmem>>, vector<128x3xf32>,
    %c0_55 = arith.constant 0 : index
    %c3 = arith.constant 3 : index
    %106 = vector.load %arg18[%c0_55, %c3] : memref<128x8xf32, #tpu.memory_space<vmem>>, vector<128x1xf32>
    tpu.vector_store %arg18[%c0_55, %c3], %103 {strides = array<i32>} : memref<128x8xf32, #tpu.memory_space<vmem>>, vector<128x1xf32>,
    return
  }
  func.func @transform_0(%arg0: i32) -> (i32, i32) {
    %c0_i32 = arith.constant 0 : i32
    %c0_i32_0 = arith.constant 0 : i32
    return %arg0, %c0_i32 : i32, i32
  }
  func.func @transform_1(%arg0: i32) -> (i32, i32) {
    %c0_i32 = arith.constant 0 : i32
    %c0_i32_0 = arith.constant 0 : i32
    %c0_i32_1 = arith.constant 0 : i32
    return %c0_i32, %c0_i32_0 : i32, i32
  }
  func.func @transform_2(%arg0: i32) -> (i32, i32) {
    %c0_i32 = arith.constant 0 : i32
    %c0_i32_0 = arith.constant 0 : i32
    %c0_i32_1 = arith.constant 0 : i32
    return %c0_i32, %c0_i32_0 : i32, i32
  }
  func.func @transform_3(%arg0: i32) -> (i32, i32) {
    %c0_i32 = arith.constant 0 : i32
    %c0_i32_0 = arith.constant 0 : i32
    %c0_i32_1 = arith.constant 0 : i32
    return %c0_i32, %c0_i32_0 : i32, i32
  }
  func.func @transform_4(%arg0: i32) -> (i32, i32) {
    %c0_i32 = arith.constant 0 : i32
    %c0_i32_0 = arith.constant 0 : i32
    %c0_i32_1 = arith.constant 0 : i32
    return %c0_i32, %c0_i32_0 : i32, i32
  }
  func.func @transform_5(%arg0: i32) -> (i32, i32) {
    %c0_i32 = arith.constant 0 : i32
    %c0_i32_0 = arith.constant 0 : i32
    %c0_i32_1 = arith.constant 0 : i32
    return %c0_i32, %c0_i32_0 : i32, i32
  }
  func.func @transform_6(%arg0: i32) -> (i32, i32) {
    %c0_i32 = arith.constant 0 : i32
    %c0_i32_0 = arith.constant 0 : i32
    %c0_i32_1 = arith.constant 0 : i32
    return %c0_i32, %c0_i32_0 : i32, i32
  }
  func.func @transform_7(%arg0: i32) -> (i32, i32) {
    %c0_i32 = arith.constant 0 : i32
    %c0_i32_0 = arith.constant 0 : i32
    %c0_i32_1 = arith.constant 0 : i32
    return %c0_i32, %c0_i32_0 : i32, i32
  }
  func.func @transform_8(%arg0: i32) -> (i32, i32) {
    %c0_i32 = arith.constant 0 : i32
    %c0_i32_0 = arith.constant 0 : i32
    %c0_i32_1 = arith.constant 0 : i32
    return %c0_i32, %c0_i32_0 : i32, i32
  }
  func.func @transform_9(%arg0: i32) -> (i32, i32) {
    %c0_i32 = arith.constant 0 : i32
    %c0_i32_0 = arith.constant 0 : i32
    %c0_i32_1 = arith.constant 0 : i32
    return %c0_i32, %c0_i32_0 : i32, i32
  }
  func.func @transform_10(%arg0: i32) -> (i32, i32) {
    %c0_i32 = arith.constant 0 : i32
    %c0_i32_0 = arith.constant 0 : i32
    %c0_i32_1 = arith.constant 0 : i32
    return %c0_i32, %c0_i32_0 : i32, i32
  }
  func.func @transform_11(%arg0: i32) -> (i32, i32) {
    %c0_i32 = arith.constant 0 : i32
    %c0_i32_0 = arith.constant 0 : i32
    %c0_i32_1 = arith.constant 0 : i32
    return %c0_i32, %c0_i32_0 : i32, i32
  }
  func.func @transform_12(%arg0: i32) -> (i32, i32) {
    %c0_i32 = arith.constant 0 : i32
    %c0_i32_0 = arith.constant 0 : i32
    %c0_i32_1 = arith.constant 0 : i32
    return %c0_i32, %c0_i32_0 : i32, i32
  }
  func.func @transform_13(%arg0: i32) -> (i32, i32) {
    %c0_i32 = arith.constant 0 : i32
    %c0_i32_0 = arith.constant 0 : i32
    %c0_i32_1 = arith.constant 0 : i32
    return %c0_i32, %c0_i32_0 : i32, i32
  }
  func.func @transform_14(%arg0: i32) -> (i32, i32) {
    %c0_i32 = arith.constant 0 : i32
    %c0_i32_0 = arith.constant 0 : i32
    %c0_i32_1 = arith.constant 0 : i32
    return %c0_i32, %c0_i32_0 : i32, i32
  }
  func.func @transform_15(%arg0: i32) -> (i32, i32) {
    %c0_i32 = arith.constant 0 : i32
    %c0_i32_0 = arith.constant 0 : i32
    %c0_i32_1 = arith.constant 0 : i32
    return %c0_i32, %c0_i32_0 : i32, i32
  }
  func.func @transform_16(%arg0: i32) -> (i32, i32) {
    %c0_i32 = arith.constant 0 : i32
    %c0_i32_0 = arith.constant 0 : i32
    %c0_i32_1 = arith.constant 0 : i32
    return %c0_i32, %c0_i32_0 : i32, i32
  }
  func.func @transform_17(%arg0: i32) -> (i32, i32) {
    %c0_i32 = arith.constant 0 : i32
    %c0_i32_0 = arith.constant 0 : i32
    return %arg0, %c0_i32 : i32, i32
  }
}

</mosaic_0001>

<bundles_post_ra>
// kernel: tpu_custom_call.1
= control target key start
LH: loop header
LB: loop body
LE: loop exit
PB: predicated region body
PF: predicated region fallthrough
CT: control target
= control target key end

     0   :  { %s3775_s24 = smov 0   ;;  %s4575_s0 = inlined_call_operand.vmem [shape: f32[256,8], index: 0, kind: input, shape index: {}]   ;;  %s4576_s1 = inlined_call_operand.vmem [shape: f32[8,256], index: 1, kind: input, shape index: {}]   ;;  %s4577_s2 = inlined_call_operand.vmem [shape: f32[1,256], index: 2, kind: input, shape index: {}]   ;;  %s4578_s3 = inlined_call_operand.vmem [shape: bf16[128,256], index: 3, kind: input, shape index: {}]   ;;  %s4579_s4 = inlined_call_operand.vmem [shape: f32[1,128], index: 4, kind: input, shape index: {}]   ;;  %s4580_s5 = inlined_call_operand.vmem [shape: bf16[128,128], index: 5, kind: input, shape index: {}]   ;;  %s4581_s6 = inlined_call_operand.vmem [shape: f32[1,128], index: 6, kind: input, shape index: {}]   ;;  %s4582_s7 = inlined_call_operand.vmem [shape: bf16[128,128], index: 7, kind: input, shape index: {}]   ;;  %s4583_s8 = inlined_call_operand.vmem [shape: f32[1,128], index: 8, kind: input, shape index: {}]   ;;  %s4584_s9 = inlined_call_operand.vmem [shape: bf16[128,128], index: 9, kind: input, shape index: {}]   ;;  %s4585_s10 = inlined_call_operand.vmem [shape: f32[1,128], index: 10, kind: input, shape index: {}]   ;;  %s4586_s11 = inlined_call_operand.vmem [shape: bf16[128,136], index: 11, kind: input, shape index: {}]   ;;  %s4587_s12 = inlined_call_operand.vmem [shape: f32[1,136], index: 12, kind: input, shape index: {}]   ;;  %s4588_s13 = inlined_call_operand.vmem [shape: bf16[256,64], index: 13, kind: input, shape index: {}]   ;;  %s4589_s14 = inlined_call_operand.vmem [shape: f32[1,64], index: 14, kind: input, shape index: {}]   ;;  %s4590_s15 = inlined_call_operand.vmem [shape: bf16[64,8], index: 15, kind: input, shape index: {}]   ;;  %s4591_s16 = inlined_call_operand.vmem [shape: f32[1,8], index: 16, kind: input, shape index: {}]   ;;  %s4592_s17 = inlined_call_operand.vmem [shape: f32[256,8], index: 17, kind: output, shape index: {}]  }
   0x1   :  { %4594 = sst [smem:[#allocation2_spill]] %s4575_s0 }
   0x2   :  { %4595 = sst [smem:[#allocation3_spill]] %s4576_s1 }
   0x3 LB: > { %s3010_s25 = sadd.s32 4294967295, %s3680_s24   ;;  %p3014_p0 = scmp.ge.s32.totalorder %s3680_s24, 1  ;;  %s3680_s24 = sphi %s3775_s24, %s27_s24  }
   0x4   : > { %p488_p1 = scmp.lt.s32.totalorder %s3680_s24, 3 }
   0x6   : > { %p489_p2 = pnand %p3014_p0, %p488_p1 }
   0x7   : > { %s4596_s28 = sld [smem:[#allocation3_spill]] (!%p489_p2)  ;;  %s3015_s30 = sshll.u32 (!%p489_p2), %s3010_s25, 4  ;;  %v3682_v2 = vmov (!%p489_p2), 0.0   ;;  %vm583_vm0 = vcmask (!%p489_p2), 64512   ;;  %v3406_v19 = vld [vmem:[%s4578_s3 + $0x4] ss:$8 sps:$4 sm:$0xff] (!%p489_p2)   ;;  %v573_v21 = vlaneseq (!%p489_p2) }
   0x8   : > { %492 = sbr.rel (%p489_p2) target bundleno = 2124 (0x84c), region = 88  ;;  %696 = vmatprep.mubr.f32.mxu0 (!%p489_p2), %v3682_v2  ;;  %p541_p3 = scmp.lt.s32.totalorder (!%p489_p2), %s3015_s30, 31  ;;  %v3408_v20 = vld [vmem:[%s4578_s3] ss:$8 sps:$4 sm:$0xff] (!%p489_p2)   ;;  %1146 = vmatprep.subr.bf16.mxu1 (!%p489_p2), %v3406_v19  ;;  %v3409_v38 = vld [vmem:[%s4578_s3 + $0x14] ss:$8 sps:$4 sm:$0xff] (!%p489_p2)  }
   0x9   : > { %s4597_s20 = sld [smem:[#allocation2_spill]] (!%p489_p2)  ;;  %1147 = vmatpush1.bf16.msra.mxu1 (!%p489_p2), %v3408_v20  ;;  %v3837_v22 = vshrl.u32 (!%p489_p2), %v573_v21, 7  ;;  %v3843_v24 = vld [vmem:[%s4577_s2] sm:$0x3] (!%p489_p2)  ;;  %v3411_v40 = vld [vmem:[%s4578_s3 + $0x10] ss:$8 sps:$4 sm:$0xff] (!%p489_p2)  }
   0xa   : > { %1148 = vmatprep.subr.bf16.mxu1 (!%p489_p2), %v3409_v38  ;;  %v3412_v43 = vld [vmem:[%s4578_s3 + $0x24] ss:$8 sps:$4 sm:$0xff] (!%p489_p2)   ;;  %v3414_v45 = vld [vmem:[%s4578_s3 + $0x20] ss:$8 sps:$4 sm:$0xff] (!%p489_p2)   ;;  %v3415_v48 = vld [vmem:[%s4578_s3 + $0x34] ss:$8 sps:$4 sm:$0xff] (!%p489_p2)  }
   0xb   : > { %v575_v23 = vsub.s32 (!%p489_p2), 0, %v3837_v22  ;;  %v3417_v50 = vld [vmem:[%s4578_s3 + $0x30] ss:$8 sps:$4 sm:$0xff] (!%p489_p2)   ;;  %v3418_v53 = vld [vmem:[%s4578_s3 + $0x44] ss:$8 sps:$4 sm:$0xff] (!%p489_p2)   ;;  %s3684_s25 = smov (!%p489_p2), 3  }
   0xc   : > { %v3420_v55 = vld [vmem:[%s4578_s3 + $0x40] ss:$8 sps:$4 sm:$0xff] (!%p489_p2)   ;;  %v3421_v58 = vld [vmem:[%s4578_s3 + $0x54] ss:$8 sps:$4 sm:$0xff] (!%p489_p2)   ;;  %v3423_v60 = vld [vmem:[%s4578_s3 + $0x50] ss:$8 sps:$4 sm:$0xff] (!%p489_p2)  }
   0xd   : > { %v570_v0 = vld [vmem:[%s4596_s28 + $0x8] sm:$0xff] (!%p489_p2)  ;;  %v569_v1 = vld [vmem:[%s4596_s28] sm:$0xff] (!%p489_p2)  ;;  %v3848_v25 = vrot.slane (!%p489_p2), %v3843_v24, %v575_v23  ;;  %1149 = vmatpush1.bf16.msra.mxu1 (!%p489_p2), %v3411_v40  ;;  %vm2622_vm1 = vcmask (!%p489_p2), 523264   ;;  %vm2856_vm2 = vcmask (!%p489_p2), 23552   ;;  %vm2937_vm3 = vcmask (!%p489_p2), 31768  }
   0xe   : > { %632 = vmatprep.subr.mxu0 (!%p489_p2), %v570_v0  ;;  %1150 = vmatprep.subr.bf16.mxu1 (!%p489_p2), %v3412_v43  ;;  %v3424_v63 = vld [vmem:[%s4578_s3 + $0x64] ss:$8 sps:$4 sm:$0xff] (!%p489_p2)  }
   0xf   : > { %633 = vmatpush1.msra.mxu0 %v569_v1  ;;  %s4599_s30 = smov (!%p541_p3, %s3015_s30), 31  ;;  %v3426_v1 = vld [vmem:[%s4578_s3 + $0x60] ss:$8 sps:$4 sm:$0xff]  }
  0x10   : > { %s3016_s18 = sshll.u32 %s4599_s30, 3 }
  0x11   : > { %s3797_s21 = scalar_lea.vmem %s4597_s20, %s3016_s18  ;;  %1151 = vmatpush1.bf16.msra.mxu1 %v3414_v45  ;;  %s4498_s0 = scalar_lea.vmem %s4592_s17, %s3016_s18 }
  0x12   : > { %v553_v3 = vld [vmem:[%s3797_s21] sm:$0xff]  ;;  %v554_v4 = vld [vmem:[%s3797_s21 + $0x8] sm:$0xff]  ;;  %v555_v5 = vld [vmem:[%s3797_s21 + $0x10] sm:$0xff]  ;;  %1152 = vmatprep.subr.bf16.mxu1 %v3415_v48 }
  0x13   : > { %3019 = vmatmul.mubr.msk.f32.vlgmr.msra.gmra.mrb[0].mxu0 %vm583_vm0, %v553_v3  ;;  %v556_v6 = vld [vmem:[%s3797_s21 + $0x18] sm:$0xff]  ;;  %v557_v7 = vld [vmem:[%s3797_s21 + $0x20] sm:$0xff]  ;;  %v558_v8 = vld [vmem:[%s3797_s21 + $0x28] sm:$0xff] }
  0x14   : > { %702 = vmatprep.mubr.f32.mxu0 %v3682_v2  ;;  %v559_v9 = vld [vmem:[%s3797_s21 + $0x30] sm:$0xff]  ;;  %v560_v10 = vld [vmem:[%s3797_s21 + $0x38] sm:$0xff]  ;;  %v561_v11 = vld [vmem:[%s3797_s21 + $0x40] sm:$0xff] }
  0x15   : > { %v562_v12 = vld [vmem:[%s3797_s21 + $0x48] sm:$0xff]  ;;  %v563_v13 = vld [vmem:[%s3797_s21 + $0x50] sm:$0xff]  ;;  %v564_v14 = vld [vmem:[%s3797_s21 + $0x58] sm:$0xff]  ;;  %1153 = vmatpush1.bf16.msra.mxu1 %v3417_v50 }
  0x16   : > { %v565_v15 = vld [vmem:[%s3797_s21 + $0x60] sm:$0xff]  ;;  %v566_v16 = vld [vmem:[%s3797_s21 + $0x68] sm:$0xff]  ;;  %v567_v17 = vld [vmem:[%s3797_s21 + $0x70] sm:$0xff]  ;;  %1154 = vmatprep.subr.bf16.mxu1 %v3418_v53 }
  0x17   : > { %3020 = vmatmul.mubr.msk.f32.gmra.mrb[2].mxu0 %vm583_vm0, %v554_v4  ;;  %v568_v18 = vld [vmem:[%s3797_s21 + $0x78] sm:$0xff]  ;;  %v3431_v53 = vld [vmem:[%s4580_s5 + $0x8] sm:$0xff]  }
  0x18   : > { %708 = vmatprep.mubr.f32.mxu0 %v3682_v2  ;;  %v3427_v4 = vld [vmem:[%s4578_s3 + $0x74] ss:$8 sps:$4 sm:$0xff]  }
  0x19   : > { %1155 = vmatpush1.bf16.msra.mxu1 %v3420_v55  ;;  %v3433_v55 = vld [vmem:[%s4580_s5 + $0x18] sm:$0xff]  }
  0x1a   : > { %1156 = vmatprep.subr.bf16.mxu1 %v3421_v58 }
  0x1b   : > { %3021 = vmatmul.mubr.msk.f32.gmra.mrb[4].mxu0 %vm583_vm0, %v555_v5 }
  0x1c   : > { %714 = vmatprep.mubr.f32.mxu0 %v3682_v2 }
  0x1d   : > { %1157 = vmatpush1.bf16.msra.mxu1 %v3423_v60 }
  0x1e   : > { %1158 = vmatprep.subr.bf16.mxu1 %v3424_v63 }
  0x1f   : > { %3022 = vmatmul.mubr.msk.f32.gmra.mrb[6].mxu0 %vm583_vm0, %v556_v6  ;;  %v3429_v6 = vld [vmem:[%s4578_s3 + $0x70] ss:$8 sps:$4 sm:$0xff]  }
  0x20   : > { %720 = vmatprep.mubr.f32.mxu0 %v3682_v2 }
  0x21   : > { %1159 = vmatpush1.bf16.msra.mxu1 %v3426_v1 }
  0x22   : > { %1160 = vmatprep.subr.bf16.mxu1 %v3427_v4 }
  0x23   : > { %3023 = vmatmul.mubr.msk.f32.gmra.mrb[8].mxu0 %vm583_vm0, %v557_v7 }
  0x24   : > { %726 = vmatprep.mubr.f32.mxu0 %v3682_v2 }
  0x25   : > { %1161 = vmatpush1.bf16.msra.mxu1 %v3429_v6 }
  0x27   : > { %3024 = vmatmul.mubr.msk.f32.gmra.mrb[10].mxu0 %vm583_vm0, %v558_v8 }
  0x28   : > { %732 = vmatprep.mubr.f32.mxu0 %v3682_v2 }
  0x2b   : > { %3025 = vmatmul.mubr.msk.f32.gmra.mrb[12].mxu0 %vm583_vm0, %v559_v9 }
  0x2c   : > { %738 = vmatprep.mubr.f32.mxu0 %v3682_v2 }
  0x2f   : > { %3026 = vmatmul.mubr.msk.f32.gmra.mrb[14].mxu0 %vm583_vm0, %v560_v10  ;;  %v3683_v10 = vmov 0  }
  0x30   : > { %744 = vmatprep.mubr.f32.mxu0 %v3682_v2  ;;  %1178 = vmatprep.mubr.bf16.mxu1 %v3683_v10 }
  0x33   : > { %3027 = vmatmul.mubr.msk.f32.gmra.mrb[16].mxu0 %vm583_vm0, %v561_v11 }
  0x34   : > { %750 = vmatprep.mubr.f32.mxu0 %v3682_v2 }
  0x37   : > { %3028 = vmatmul.mubr.msk.f32.gmra.mrb[18].mxu0 %vm583_vm0, %v562_v12 }
  0x38   : > { %756 = vmatprep.mubr.f32.mxu0 %v3682_v2 }
  0x3b   : > { %3029 = vmatmul.mubr.msk.f32.gmra.mrb[20].mxu0 %vm583_vm0, %v563_v13 }
  0x3c   : > { %762 = vmatprep.mubr.f32.mxu0 %v3682_v2 }
  0x3f   : > { %3030 = vmatmul.mubr.msk.f32.gmra.mrb[22].mxu0 %vm583_vm0, %v564_v14 }
  0x40   : > { %768 = vmatprep.mubr.f32.mxu0 %v3682_v2 }
  0x43   : > { %3031 = vmatmul.mubr.msk.f32.gmra.mrb[24].mxu0 %vm583_vm0, %v565_v15 }
  0x44   : > { %774 = vmatprep.mubr.f32.mxu0 %v3682_v2 }
  0x47   : > { %3032 = vmatmul.mubr.msk.f32.gmra.mrb[26].mxu0 %vm583_vm0, %v566_v16 }
  0x48   : > { %780 = vmatprep.mubr.f32.mxu0 %v3682_v2 }
  0x4b   : > { %3033 = vmatmul.mubr.msk.f32.gmra.mrb[28].mxu0 %vm583_vm0, %v567_v17  ;;  %v579_v17 = vsub.s32 1, %v3837_v22 }
  0x4c   : > { %786 = vmatprep.mubr.f32.mxu0 %v3682_v2 }
  0x4d   : > { %v580_v21 = vrot.slane %v3843_v24, %v579_v17 }
  0x4f   : > { %3034 = vmatmul.mubr.msk.f32.gmra.mrb[30].mxu0 %vm583_vm0, %v568_v18 }
  0xe6   : > { %v698_v26 = vpop.f32.mrb[0].mxu0 }
  0xe7   : > { %v3851_v27 = vadd.f32 %v698_v26, %v3848_v25  ;;  %v3853_v28 = vpop.f32.mrb[1].mxu0 }
  0xe9   : > { %793 = vadd.xlane.f32.xlu0 %v3851_v27 }
  0xea   : > { %v704_v29 = vpop.f32.mrb[2].mxu0 }
  0xeb   : > { %v3857_v30 = vadd.f32 %v704_v29, %v3848_v25  ;;  %v3859_v31 = vpop.f32.mrb[3].mxu0 }
  0xec   : > { %v3982_v24 = vadd.f32 %v3859_v31, %v580_v21 }
  0xed   : > { %795 = vadd.xlane.f32.xlu0 %v3857_v30 }
  0xee   : > { %v710_v32 = vpop.f32.mrb[4].mxu0 }
  0xef   : > { %v3863_v33 = vadd.f32 %v710_v32, %v3848_v25  ;;  %v3865_v34 = vpop.f32.mrb[5].mxu0 }
  0xf0   : > { %v3985_v40 = vadd.f32 %v3865_v34, %v580_v21 }
  0xf1   : > { %797 = vadd.xlane.f32.xlu1 %v3863_v33 }
  0xf2   : > { %v716_v35 = vpop.f32.mrb[6].mxu0 }
  0xf3   : > { %v3869_v36 = vadd.f32 %v716_v35, %v3848_v25  ;;  %v3871_v37 = vpop.f32.mrb[7].mxu0  ;;  %v3974_v35 = vadd.f32 %v3853_v28, %v580_v21 }
  0xf4   : > { %v3990_v28 = vadd.f32 %v3871_v37, %v580_v21 }
  0xf5   : > { %799 = vadd.xlane.f32.xlu1 %v3869_v36 }
  0xf6   : > { %v722_v39 = vpop.f32.mrb[8].mxu0 }
  0xf7   : > { %v3881_v41 = vadd.f32 %v722_v39, %v3848_v25  ;;  %v3883_v42 = vpop.f32.mrb[9].mxu0 }
  0xf9   : > { %801 = vadd.xlane.f32.xlu0 %v3881_v41 }
  0xfa   : > { %v728_v44 = vpop.f32.mrb[10].mxu0 }
  0xfb   : > { %v3893_v46 = vadd.f32 %v728_v44, %v3848_v25  ;;  %v3895_v47 = vpop.f32.mrb[11].mxu0 }
  0xfc   : > { %v3998_v31 = vadd.f32 %v3895_v47, %v580_v21 }
  0xfd   : > { %803 = vadd.xlane.f32.xlu1 %v3893_v46 }
  0xfe   : > { %v734_v49 = vpop.f32.mrb[12].mxu0 }
  0xff   : > { %v3905_v51 = vadd.f32 %v734_v49, %v3848_v25  ;;  %v3907_v52 = vpop.f32.mrb[13].mxu0 }
 0x100   : > { %v4001_v34 = vadd.f32 %v3907_v52, %v580_v21  ;;  %v3430_v52 = vld [vmem:[%s4580_s5] sm:$0xff]  }
 0x101   : > { %805 = vadd.xlane.f32.xlu0 %v3905_v51  ;;  %3267 = vmatprep.subr.bf16.mxu0 %v3430_v52 }
 0x102   : > { %v740_v54 = vpop.f32.mrb[14].mxu0  ;;  %3268 = vmatpush3.bf16.msra.mxu0 %v3430_v52 }
 0x103   : > { %v3917_v56 = vadd.f32 %v740_v54, %v3848_v25  ;;  %v3919_v57 = vpop.f32.mrb[15].mxu0  ;;  %3269 = vmatprep.subr.bf16.mxu0 %v3431_v53  ;;  %v3432_v54 = vld [vmem:[%s4580_s5 + $0x10] sm:$0xff]  }
 0x104   : > { %v4006_v37 = vadd.f32 %v3919_v57, %v580_v21 }
 0x105   : > { %807 = vadd.xlane.f32.xlu1 %v3917_v56 }
 0x106   : > { %v746_v59 = vpop.f32.mrb[16].mxu0  ;;  %3270 = vmatpush3.bf16.msra.mxu0 %v3431_v53 }
 0x107   : > { %v3929_v61 = vadd.f32 %v746_v59, %v3848_v25  ;;  %v748_v62 = vpop.f32.mrb[17].mxu0  ;;  %3271 = vmatprep.subr.bf16.mxu0 %v3432_v54 }
 0x108   : > { %v4008_v43 = vadd.f32 %v748_v62, %v580_v21 }
 0x109   : > { %809 = vadd.xlane.f32.xlu0 %v3929_v61 }
 0x10a   : > { %v752_v0 = vpop.f32.mrb[18].mxu0  ;;  %3272 = vmatpush3.bf16.msra.mxu0 %v3432_v54 }
 0x10b   : > { %v3939_v2 = vadd.f32 %v752_v0, %v3848_v25  ;;  %v754_v3 = vpop.f32.mrb[19].mxu0  ;;  %3273 = vmatprep.subr.bf16.mxu0 %v3433_v55 }
 0x10d   : > { %811 = vadd.xlane.f32.xlu1 %v3939_v2 }
 0x10e   : > { %v758_v5 = vpop.f32.mrb[20].mxu0  ;;  %3274 = vmatpush3.bf16.msra.mxu0 %v3433_v55 }
 0x10f   : > { %v3949_v7 = vadd.f32 %v758_v5, %v3848_v25  ;;  %v760_v8 = vpop.f32.mrb[21].mxu0 }
 0x110   : > { %v4014_v44 = vadd.f32 %v760_v8, %v580_v21 }
 0x111   : > { %813 = vadd.xlane.f32.xlu0 %v3949_v7 }
 0x112   : > { %v764_v9 = vpop.f32.mrb[22].mxu0 }
 0x113   : > { %v3954_v11 = vadd.f32 %v764_v9, %v3848_v25  ;;  %v766_v12 = vpop.f32.mrb[23].mxu0 }
 0x114   : > { %v4018_v45 = vadd.f32 %v766_v12, %v580_v21 }
 0x115   : > { %815 = vadd.xlane.f32.xlu1 %v3954_v11 }
 0x116   : > { %v770_v13 = vpop.f32.mrb[24].mxu0 }
 0x117   : > { %v3958_v14 = vadd.f32 %v770_v13, %v3848_v25  ;;  %v772_v15 = vpop.f32.mrb[25].mxu0 }
 0x118   : > { %v4020_v47 = vadd.f32 %v772_v15, %v580_v21 }
 0x119   : > { %817 = vadd.xlane.f32.xlu0 %v3958_v14 }
 0x11a   : > { %v776_v16 = vpop.f32.mrb[26].mxu0 }
 0x11b   : > { %v3963_v18 = vadd.f32 %v776_v16, %v3848_v25  ;;  %v778_v19 = vpop.f32.mrb[27].mxu0 }
 0x11c   : > { %v4024_v48 = vadd.f32 %v778_v19, %v580_v21 }
 0x11d   : > { %819 = vadd.xlane.f32.xlu1 %v3963_v18 }
 0x11e   : > { %v782_v20 = vpop.f32.mrb[28].mxu0 }
 0x11f   : > { %v3970_v26 = vadd.f32 %v782_v20, %v3848_v25  ;;  %v784_v29 = vpop.f32.mrb[29].mxu0 }
 0x120   : > { %v4026_v49 = vadd.f32 %v784_v29, %v580_v21 }
 0x121   : > { %821 = vadd.xlane.f32.xlu0 %v3970_v26 }
 0x122   : > { %v788_v32 = vpop.f32.mrb[30].mxu0 }
 0x123   : > { %v3977_v38 = vadd.f32 %v788_v32, %v3848_v25  ;;  %v790_v39 = vpop.f32.mrb[31].mxu0  ;;  %v3993_v25 = vadd.f32 %v3883_v42, %v580_v21  ;;  %v4012_v42 = vadd.f32 %v754_v3, %v580_v21 }
 0x124   : > { %v4030_v50 = vadd.f32 %v790_v39, %v580_v21 }
 0x125   : > { %823 = vadd.xlane.f32.xlu1 %v3977_v38  ;;  %842 = vadd.xlane.f32.xlu0 %v3974_v35 }
 0x129   : > { %844 = vadd.xlane.f32.xlu1 %v3982_v24  ;;  %846 = vadd.xlane.f32.xlu0 %v3985_v40 }
 0x12d   : > { %848 = vadd.xlane.f32.xlu1 %v3990_v28  ;;  %850 = vadd.xlane.f32.xlu0 %v3993_v25 }
 0x131   : > { %852 = vadd.xlane.f32.xlu1 %v3998_v31  ;;  %854 = vadd.xlane.f32.xlu0 %v4001_v34 }
 0x135   : > { %856 = vadd.xlane.f32.xlu1 %v4006_v37  ;;  %858 = vadd.xlane.f32.xlu0 %v4008_v43 }
 0x139   : > { %860 = vadd.xlane.f32.xlu1 %v4012_v42  ;;  %862 = vadd.xlane.f32.xlu0 %v4014_v44 }
 0x13d   : > { %864 = vadd.xlane.f32.xlu1 %v4018_v45  ;;  %866 = vadd.xlane.f32.xlu0 %v4020_v47 }
 0x141   : > { %868 = vadd.xlane.f32.xlu1 %v4024_v48  ;;  %870 = vadd.xlane.f32.xlu0 %v4026_v49 }
 0x145   : > { %872 = vadd.xlane.f32.xlu1 %v4030_v50 }
 0x176   : > { %v794_v57 = vpop.xlane.xlu0 %793 }
 0x177   : > { %v826_v58 = vmul.f32 0.0078125, %v794_v57 }
 0x179   : > { %v890_v59 = vsub.f32 %v826_v58, %v3851_v27 }
 0x17a   : > { %v796_v60 = vpop.xlane.xlu0 %795 }
 0x17b   : > { %v827_v62 = vmul.f32 0.0078125, %v796_v60  ;;  %v906_v63 = vmul.f32 %v890_v59, %v890_v59 }
 0x17d   : > { %v891_v0 = vsub.f32 %v827_v62, %v3857_v30  ;;  %v922_v5 = vmul.f32 -0.5, %v906_v63 }
 0x17e   : > { %v798_v1 = vpop.xlane.xlu1 %797 }
 0x17f   : > { %v907_v3 = vmul.f32 %v891_v0, %v891_v0  ;;  %v828_v4 = vmul.f32 0.0078125, %v798_v1 }
 0x181   : > { %v923_v6 = vmul.f32 -0.5, %v907_v3  ;;  %v892_v8 = vsub.f32 %v828_v4, %v3863_v33 }
 0x182   : > { %v800_v9 = vpop.xlane.xlu1 %799 }
 0x183   : > { %v938_v12 = vpack.c.bf16 %v923_v6, %v922_v5  ;;  %v829_v13 = vmul.f32 0.0078125, %v800_v9  ;;  %v908_v16 = vmul.f32 %v892_v8, %v892_v8 }
 0x185   : > { %v947_v15 = vmul.bf16 1069105081, %v938_v12  ;;  %v893_v19 = vsub.f32 %v829_v13, %v3869_v36  ;;  %v924_v29 = vmul.f32 -0.5, %v908_v16 }
 0x186   : > { %v802_v27 = vpop.xlane.xlu0 %801 }
 0x187   : > { %3498 = vpow.bf16 %v947_v15  ;;  %v909_v20 = vmul.f32 %v893_v19, %v893_v19  ;;  %v830_v21 = vmul.f32 0.0078125, %v802_v27 }
 0x189   : > { %v925_v30 = vmul.f32 -0.5, %v909_v20  ;;  %v894_v32 = vsub.f32 %v830_v21, %v3881_v41 }
 0x18a   : > { %v804_v39 = vpop.xlane.xlu1 %803 }
 0x18b   : > { %v939_v52 = vpack.c.bf16 %v925_v30, %v924_v29  ;;  %v831_v53 = vmul.f32 0.0078125, %v804_v39  ;;  %v910_v33 = vmul.f32 %v894_v32, %v894_v32 }
 0x18d   : > { %v950_v54 = vmul.bf16 1069105081, %v939_v52  ;;  %v895_v55 = vsub.f32 %v831_v53, %v3893_v46  ;;  %v926_v36 = vmul.f32 -0.5, %v910_v33 }
 0x18e   : > { %v806_v57 = vpop.xlane.xlu0 %805 }
 0x18f   : > { %3500 = vpow.bf16 %v950_v54  ;;  %v911_v58 = vmul.f32 %v895_v55, %v895_v55  ;;  %v832_v59 = vmul.f32 0.0078125, %v806_v57 }
 0x191   : > { %v927_v60 = vmul.f32 -0.5, %v911_v58  ;;  %v896_v62 = vsub.f32 %v832_v59, %v3905_v51 }
 0x192   : > { %v3499_v63 = vpop.eup %3498  ;;  %v808_v0 = vpop.xlane.xlu1 %807 }
 0x193   : > { %v940_v1 = vpack.c.bf16 %v927_v60, %v926_v36  ;;  %v833_v3 = vmul.f32 0.0078125, %v808_v0  ;;  %1179 = vmatmul.mubr.bf16.vlgmr.msra.gmra.mrb[0].mxu1 %v3499_v63  ;;  %v912_v4 = vmul.f32 %v896_v62, %v896_v62 }
 0x194   : > { %1188 = vmatprep.mubr.bf16.mxu1 %v3683_v10 }
 0x195   : > { %v953_v41 = vmul.bf16 1069105081, %v940_v1  ;;  %v897_v5 = vsub.f32 %v833_v3, %v3917_v56  ;;  %v928_v9 = vmul.f32 -0.5, %v912_v4 }
 0x196   : > { %v810_v46 = vpop.xlane.xlu0 %809 }
 0x197   : > { %3502 = vpow.bf16 %v953_v41  ;;  %v913_v6 = vmul.f32 %v897_v5, %v897_v5  ;;  %v834_v8 = vmul.f32 0.0078125, %v810_v46 }
 0x199   : > { %v929_v12 = vmul.f32 -0.5, %v913_v6  ;;  %v898_v13 = vsub.f32 %v834_v8, %v3929_v61 }
 0x19a   : > { %v3501_v51 = vpop.eup %3500  ;;  %v812_v15 = vpop.xlane.xlu1 %811 }
 0x19b   : > { %v941_v16 = vpack.c.bf16 %v929_v12, %v928_v9  ;;  %v835_v19 = vmul.f32 0.0078125, %v812_v15  ;;  %1189 = vmatmul.mubr.bf16.gmra.mrb[4].mxu1 %v3501_v51  ;;  %v914_v20 = vmul.f32 %v898_v13, %v898_v13 }
 0x19c   : > { %1198 = vmatprep.mubr.bf16.mxu1 %v3683_v10 }
 0x19d   : > { %v956_v27 = vmul.bf16 1069105081, %v941_v16  ;;  %v899_v21 = vsub.f32 %v835_v19, %v3939_v2  ;;  %v930_v32 = vmul.f32 -0.5, %v914_v20 }
 0x19e   : > { %v814_v56 = vpop.xlane.xlu0 %813 }
 0x19f   : > { %3504 = vpow.bf16 %v956_v27  ;;  %v915_v29 = vmul.f32 %v899_v21, %v899_v21  ;;  %v836_v30 = vmul.f32 0.0078125, %v814_v56 }
 0x1a1   : > { %v931_v39 = vmul.f32 -0.5, %v915_v29  ;;  %v900_v52 = vsub.f32 %v836_v30, %v3949_v7 }
 0x1a2   : > { %v3503_v61 = vpop.eup %3502  ;;  %v816_v53 = vpop.xlane.xlu1 %815 }
 0x1a3   : > { %v942_v54 = vpack.c.bf16 %v931_v39, %v930_v32  ;;  %v837_v33 = vmul.f32 0.0078125, %v816_v53  ;;  %1199 = vmatmul.mubr.bf16.gmra.mrb[8].mxu1 %v3503_v61  ;;  %v916_v57 = vmul.f32 %v900_v52, %v900_v52  ;;  %v3435_v39 = vld [vmem:[%s4580_s5 + $0x28] sm:$0xff]   ;;  %v3436_v52 = vld [vmem:[%s4580_s5 + $0x30] sm:$0xff]   ;;  %v3437_v61 = vld [vmem:[%s4580_s5 + $0x38] sm:$0xff]  }
 0x1a4   : > { %1208 = vmatprep.mubr.bf16.mxu1 %v3683_v10  ;;  %v3438_v53 = vld [vmem:[%s4582_s7] sm:$0xff]  }
 0x1a5   : > { %v959_v55 = vmul.bf16 1069105081, %v942_v54  ;;  %v901_v58 = vsub.f32 %v837_v33, %v3954_v11  ;;  %v932_v60 = vmul.f32 -0.5, %v916_v57  ;;  %v3439_v54 = vld [vmem:[%s4582_s7 + $0x8] sm:$0xff]   ;;  %3299 = vmatprep.subr.bf16.mxu1 %v3438_v53  ;;  %v3440_v33 = vld [vmem:[%s4582_s7 + $0x10] sm:$0xff]   ;;  %v3442_v57 = vld [vmem:[%s4582_s7 + $0x20] sm:$0xff]  }
 0x1a6   : > { %v818_v2 = vpop.xlane.xlu0 %817  ;;  %3300 = vmatpush3.bf16.msra.mxu1 %v3438_v53 }
 0x1a7   : > { %3506 = vpow.bf16 %v959_v55  ;;  %v917_v59 = vmul.f32 %v901_v58, %v901_v58  ;;  %v838_v36 = vmul.f32 0.0078125, %v818_v2  ;;  %3301 = vmatprep.subr.bf16.mxu1 %v3439_v54  ;;  %v3441_v55 = vld [vmem:[%s4582_s7 + $0x18] sm:$0xff]   ;;  %v4098_v58 = vld [vmem:[%s4579_s4] ss:$0 sm:$0xff] }
 0x1a9   : > { %v933_v62 = vmul.f32 -0.5, %v917_v59  ;;  %v902_v63 = vsub.f32 %v838_v36, %v3958_v14 }
 0x1aa   : > { %v3505_v7 = vpop.eup %3504  ;;  %v820_v0 = vpop.xlane.xlu1 %819  ;;  %3302 = vmatpush3.bf16.msra.mxu1 %v3439_v54 }
 0x1ab   : > { %v943_v1 = vpack.c.bf16 %v933_v62, %v932_v60  ;;  %v839_v3 = vmul.f32 0.0078125, %v820_v0  ;;  %1209 = vmatmul.mubr.bf16.gmra.mrb[12].mxu1 %v3505_v7  ;;  %v918_v4 = vmul.f32 %v902_v63, %v902_v63  ;;  %3303 = vmatprep.subr.bf16.mxu1 %v3440_v33 }
 0x1ac   : > { %1218 = vmatprep.mubr.bf16.mxu1 %v3683_v10 }
 0x1ad   : > { %v962_v41 = vmul.bf16 1069105081, %v943_v1  ;;  %v903_v5 = vsub.f32 %v839_v3, %v3963_v18  ;;  %v934_v8 = vmul.f32 -0.5, %v918_v4 }
 0x1ae   : > { %v822_v11 = vpop.xlane.xlu0 %821  ;;  %3304 = vmatpush3.bf16.msra.mxu1 %v3440_v33 }
 0x1af   : > { %3508 = vpow.bf16 %v962_v41  ;;  %v919_v46 = vmul.f32 %v903_v5, %v903_v5  ;;  %v840_v6 = vmul.f32 0.0078125, %v822_v11  ;;  %3305 = vmatprep.subr.bf16.mxu1 %v3441_v55 }
 0x1b1   : > { %v935_v9 = vmul.f32 -0.5, %v919_v46  ;;  %v904_v12 = vsub.f32 %v840_v6, %v3970_v26 }
 0x1b2   : > { %v3507_v14 = vpop.eup %3506  ;;  %v824_v13 = vpop.xlane.xlu1 %823  ;;  %3306 = vmatpush3.bf16.msra.mxu1 %v3441_v55 }
 0x1b3   : > { %v944_v51 = vpack.c.bf16 %v935_v9, %v934_v8  ;;  %v841_v15 = vmul.f32 0.0078125, %v824_v13  ;;  %1219 = vmatmul.mubr.bf16.gmra.mrb[16].mxu1 %v3507_v14  ;;  %v920_v19 = vmul.f32 %v904_v12, %v904_v12  ;;  %3307 = vmatprep.subr.bf16.mxu1 %v3442_v57 }
 0x1b4   : > { %1228 = vmatprep.mubr.bf16.mxu1 %v3683_v10 }
 0x1b5   : > { %v965_v16 = vmul.bf16 1069105081, %v944_v51  ;;  %v905_v27 = vsub.f32 %v841_v15, %v3977_v38  ;;  %v936_v20 = vmul.f32 -0.5, %v920_v19  ;;  %v3434_v38 = vld [vmem:[%s4580_s5 + $0x20] sm:$0xff]  }
 0x1b6   : > { %3275 = vmatprep.subr.bf16.mxu0 %v3434_v38  ;;  %3308 = vmatpush3.bf16.msra.mxu1 %v3442_v57 }
 0x1b7   : > { %3510 = vpow.bf16 %v965_v16  ;;  %v921_v18 = vmul.f32 %v905_v27, %v905_v27  ;;  %3276 = vmatpush3.bf16.msra.mxu0 %v3434_v38 }
 0x1b8   : > { %3277 = vmatprep.subr.bf16.mxu0 %v3435_v39 }
 0x1b9   : > { %v937_v21 = vmul.f32 -0.5, %v921_v18 }
 0x1ba   : > { %v3509_v56 = vpop.eup %3508 }
 0x1bb   : > { %v945_v29 = vpack.c.bf16 %v937_v21, %v936_v20  ;;  %1229 = vmatmul.mubr.bf16.gmra.mrb[20].mxu1 %v3509_v56  ;;  %3278 = vmatpush3.bf16.msra.mxu0 %v3435_v39 }
 0x1bc   : > { %1238 = vmatprep.mubr.bf16.mxu1 %v3683_v10  ;;  %3279 = vmatprep.subr.bf16.mxu0 %v3436_v52 }
 0x1bd   : > { %v968_v26 = vmul.bf16 1069105081, %v945_v29 }
 0x1bf   : > { %3512 = vpow.bf16 %v968_v26  ;;  %3280 = vmatpush3.bf16.msra.mxu0 %v3436_v52 }
 0x1c0   : > { %3281 = vmatprep.subr.bf16.mxu0 %v3437_v61 }
 0x1c2   : > { %v3511_v30 = vpop.eup %3510 }
 0x1c3   : > { %1239 = vmatmul.mubr.bf16.gmra.mrb[24].mxu1 %v3511_v30  ;;  %3282 = vmatpush3.bf16.msra.mxu0 %v3437_v61 }
 0x1c4   : > { %1248 = vmatprep.mubr.bf16.mxu1 %v3683_v10 }
 0x1ca   : > { %v3513_v32 = vpop.eup %3512 }
 0x1cb   : > { %1249 = vmatmul.mubr.bf16.gmra.mrb[28].mxu1 %v3513_v32 }
 0x266   : > { %v1180_v2 = vpop.f32.mrb[0].mxu1 }
 0x267   : > { %v1266_v59 = vadd.f32 %v4098_v58, %v1180_v2  ;;  %v4101_v36 = vpop.f32.mrb[1].mxu1 }
 0x268   : > { %v1184_v60 = vpop.f32.mrb[2].mxu1 }
 0x269   : > { %v1282_v62 = vmul.f32 %v1266_v59, %v1266_v59  ;;  %v1267_v63 = vadd.f32 %v4098_v58, %v1184_v60  ;;  %v4104_v7 = vpop.f32.mrb[3].mxu1 }
 0x26b   : > { %v1283_v0 = vmul.f32 %v1267_v63, %v1267_v63  ;;  %v1298_v1 = vmul.f32 -0.5, %v1282_v62 }
 0x26d   : > { %v1299_v3 = vmul.f32 -0.5, %v1283_v0 }
 0x26e   : > { %v1190_v41 = vpop.f32.mrb[4].mxu1 }
 0x26f   : > { %v1314_v4 = vpack.c.bf16 %v1299_v3, %v1298_v1  ;;  %v1268_v5 = vadd.f32 %v4098_v58, %v1190_v41  ;;  %v4107_v11 = vpop.f32.mrb[5].mxu1 }
 0x270   : > { %v1194_v46 = vpop.f32.mrb[6].mxu1 }
 0x271   : > { %v1323_v6 = vmul.bf16 1069105081, %v1314_v4  ;;  %v1284_v8 = vmul.f32 %v1268_v5, %v1268_v5  ;;  %v1269_v9 = vadd.f32 %v4098_v58, %v1194_v46  ;;  %v4110_v12 = vpop.f32.mrb[7].mxu1 }
 0x273   : > { %3514 = vpow.bf16 %v1323_v6  ;;  %v1285_v14 = vmul.f32 %v1269_v9, %v1269_v9  ;;  %v1300_v13 = vmul.f32 -0.5, %v1284_v8 }
 0x275   : > { %v1301_v51 = vmul.f32 -0.5, %v1285_v14 }
 0x276   : > { %v1200_v15 = vpop.f32.mrb[8].mxu1 }
 0x277   : > { %v1315_v16 = vpack.c.bf16 %v1301_v51, %v1300_v13  ;;  %v1270_v19 = vadd.f32 %v4098_v58, %v1200_v15  ;;  %v4113_v27 = vpop.f32.mrb[9].mxu1 }
 0x278   : > { %v1204_v18 = vpop.f32.mrb[10].mxu1 }
 0x279   : > { %v1326_v20 = vmul.bf16 1069105081, %v1315_v16  ;;  %v1286_v21 = vmul.f32 %v1270_v19, %v1270_v19  ;;  %v1271_v56 = vadd.f32 %v4098_v58, %v1204_v18  ;;  %v4116_v29 = vpop.f32.mrb[11].mxu1 }
 0x27b   : > { %3516 = vpow.bf16 %v1326_v20  ;;  %v1287_v26 = vmul.f32 %v1271_v56, %v1271_v56  ;;  %v1302_v30 = vmul.f32 -0.5, %v1286_v21 }
 0x27d   : > { %v1303_v32 = vmul.f32 -0.5, %v1287_v26 }
 0x27e   : > { %v3515_v38 = vpop.eup %3514  ;;  %v1210_v39 = vpop.f32.mrb[12].mxu1 }
 0x27f   : > { %v1316_v52 = vpack.c.bf16 %v1303_v32, %v1302_v30  ;;  %v1272_v61 = vadd.f32 %v4098_v58, %v1210_v39  ;;  %v4119_v53 = vpop.f32.mrb[13].mxu1  ;;  %3283 = vmatprep.mubr.bf16.mxu0 %v3515_v38 }
 0x280   : > { %v1214_v54 = vpop.f32.mrb[14].mxu1 }
 0x281   : > { %v1329_v33 = vmul.bf16 1069105081, %v1316_v52  ;;  %v1288_v55 = vmul.f32 %v1272_v61, %v1272_v61  ;;  %v1273_v57 = vadd.f32 %v4098_v58, %v1214_v54  ;;  %v4122_v2 = vpop.f32.mrb[15].mxu1 }
 0x283   : > { %3518 = vpow.bf16 %v1329_v33  ;;  %v1289_v59 = vmul.f32 %v1273_v57, %v1273_v57  ;;  %v1304_v60 = vmul.f32 -0.5, %v1288_v55 }
 0x285   : > { %v1305_v62 = vmul.f32 -0.5, %v1289_v59 }
 0x286   : > { %v3517_v63 = vpop.eup %3516  ;;  %v1220_v0 = vpop.f32.mrb[16].mxu1 }
 0x287   : > { %v1317_v1 = vpack.c.bf16 %v1305_v62, %v1304_v60  ;;  %v1274_v3 = vadd.f32 %v4098_v58, %v1220_v0  ;;  %v4125_v41 = vpop.f32.mrb[17].mxu1  ;;  %3284 = vmatmul.mubr.bf16.vlgmr.msra.gmra.mrb[32].mxu0 %v3517_v63 }
 0x288   : > { %v1224_v4 = vpop.f32.mrb[18].mxu1 }
 0x289   : > { %v1332_v5 = vmul.bf16 1069105081, %v1317_v1  ;;  %v1290_v46 = vmul.f32 %v1274_v3, %v1274_v3  ;;  %v1275_v6 = vadd.f32 %v4098_v58, %v1224_v4  ;;  %v4128_v8 = vpop.f32.mrb[19].mxu1 }
 0x28b   : > { %3520 = vpow.bf16 %v1332_v5  ;;  %v1291_v9 = vmul.f32 %v1275_v6, %v1275_v6  ;;  %v1306_v14 = vmul.f32 -0.5, %v1290_v46 }
 0x28d   : > { %v1307_v13 = vmul.f32 -0.5, %v1291_v9 }
 0x28e   : > { %v3519_v51 = vpop.eup %3518  ;;  %v1230_v15 = vpop.f32.mrb[20].mxu1 }
 0x28f   : > { %v1318_v16 = vpack.c.bf16 %v1307_v13, %v1306_v14  ;;  %v1276_v19 = vadd.f32 %v4098_v58, %v1230_v15  ;;  %v4131_v18 = vpop.f32.mrb[21].mxu1  ;;  %3287 = vmatprep.mubr.bf16.mxu0 %v3519_v51 }
 0x290   : > { %v1234_v20 = vpop.f32.mrb[22].mxu1 }
 0x291   : > { %v1335_v21 = vmul.bf16 1069105081, %v1318_v16  ;;  %v1292_v56 = vmul.f32 %v1276_v19, %v1276_v19  ;;  %v1277_v26 = vadd.f32 %v4098_v58, %v1234_v20  ;;  %v4134_v30 = vpop.f32.mrb[23].mxu1 }
 0x293   : > { %3522 = vpow.bf16 %v1335_v21  ;;  %v1293_v32 = vmul.f32 %v1277_v26, %v1277_v26  ;;  %v1308_v38 = vmul.f32 -0.5, %v1292_v56 }
 0x295   : > { %v1309_v39 = vmul.f32 -0.5, %v1293_v32 }
 0x296   : > { %v3521_v52 = vpop.eup %3520  ;;  %v1240_v61 = vpop.f32.mrb[24].mxu1 }
 0x297   : > { %v1319_v54 = vpack.c.bf16 %v1309_v39, %v1308_v38  ;;  %v1278_v33 = vadd.f32 %v4098_v58, %v1240_v61  ;;  %v4137_v55 = vpop.f32.mrb[25].mxu1  ;;  %3288 = vmatmul.mubr.bf16.gmra.mrb[36].mxu0 %v3521_v52  ;;  %v3443_v52 = vld [vmem:[%s4582_s7 + $0x28] sm:$0xff]   ;;  %v3445_v61 = vld [vmem:[%s4582_s7 + $0x38] sm:$0xff]  }
 0x298   : > { %v1244_v57 = vpop.f32.mrb[26].mxu1  ;;  %3309 = vmatprep.subr.bf16.mxu1 %v3443_v52 }
 0x299   : > { %v1338_v59 = vmul.bf16 1069105081, %v1319_v54  ;;  %v1294_v60 = vmul.f32 %v1278_v33, %v1278_v33  ;;  %v1279_v62 = vadd.f32 %v4098_v58, %v1244_v57  ;;  %v4140_v63 = vpop.f32.mrb[27].mxu1  ;;  %3310 = vmatpush3.bf16.msra.mxu1 %v3443_v52  ;;  %v3446_v54 = vld [vmem:[%s4584_s9] sm:$0xff]  }
 0x29a   : > { %3331 = vmatprep.subr.bf16.mxu0 %v3446_v54  ;;  %v4163_v33 = vld [vmem:[%s4581_s6] ss:$0 sm:$0xff] }
 0x29b   : > { %3524 = vpow.bf16 %v1338_v59  ;;  %v1295_v0 = vmul.f32 %v1279_v62, %v1279_v62  ;;  %v1310_v1 = vmul.f32 -0.5, %v1294_v60  ;;  %3332 = vmatpush3.bf16.msra.mxu0 %v3446_v54 }
 0x29d   : > { %v1311_v3 = vmul.f32 -0.5, %v1295_v0 }
 0x29e   : > { %v3523_v4 = vpop.eup %3522  ;;  %v1250_v5 = vpop.f32.mrb[28].mxu1 }
 0x29f   : > { %v1320_v46 = vpack.c.bf16 %v1311_v3, %v1310_v1  ;;  %v1280_v6 = vadd.f32 %v4098_v58, %v1250_v5  ;;  %v4143_v9 = vpop.f32.mrb[29].mxu1  ;;  %3291 = vmatprep.mubr.bf16.mxu0 %v3523_v4 }
 0x2a0   : > { %v1254_v14 = vpop.f32.mrb[30].mxu1 }
 0x2a1   : > { %v1341_v13 = vmul.bf16 1069105081, %v1320_v46  ;;  %v1296_v51 = vmul.f32 %v1280_v6, %v1280_v6  ;;  %v1281_v15 = vadd.f32 %v4098_v58, %v1254_v14  ;;  %v4146_v16 = vpop.f32.mrb[31].mxu1  ;;  %v3444_v58 = vld [vmem:[%s4582_s7 + $0x30] sm:$0xff]  }
 0x2a2   : > { %3311 = vmatprep.subr.bf16.mxu1 %v3444_v58 }
 0x2a3   : > { %3526 = vpow.bf16 %v1341_v13  ;;  %v1297_v19 = vmul.f32 %v1281_v15, %v1281_v15  ;;  %v1312_v20 = vmul.f32 -0.5, %v1296_v51  ;;  %3312 = vmatpush3.bf16.msra.mxu1 %v3444_v58 }
 0x2a4   : > { %3313 = vmatprep.subr.bf16.mxu1 %v3445_v61 }
 0x2a5   : > { %v1313_v21 = vmul.f32 -0.5, %v1297_v19 }
 0x2a6   : > { %v3525_v56 = vpop.eup %3524 }
 0x2a7   : > { %v1321_v26 = vpack.c.bf16 %v1313_v21, %v1312_v20  ;;  %3292 = vmatmul.mubr.bf16.gmra.mrb[40].mxu0 %v3525_v56  ;;  %3314 = vmatpush3.bf16.msra.mxu1 %v3445_v61 }
 0x2a9   : > { %v1344_v32 = vmul.bf16 1069105081, %v1321_v26 }
 0x2ab   : > { %3528 = vpow.bf16 %v1344_v32 }
 0x2ae   : > { %v3527_v38 = vpop.eup %3526 }
 0x2af   : > { %3295 = vmatprep.mubr.bf16.mxu0 %v3527_v38 }
 0x2b6   : > { %v3529_v39 = vpop.eup %3528 }
 0x2b7   : > { %3296 = vmatmul.mubr.bf16.gmra.mrb[44].mxu0 %v3529_v39 }
 0x35a   : > { %v3285_v57 = vpop.f32.mrb[32].mxu0 }
 0x35b   : > { %v1460_v59 = vadd.f32 %v3285_v57, %v4163_v33  ;;  %v1451_v60 = vpop.f32.mrb[33].mxu0 }
 0x35c   : > { %v1452_v62 = vadd.f32 %v4163_v33, %v1451_v60  ;;  %v3286_v0 = vpop.f32.mrb[34].mxu0 }
 0x35d   : > { %v1516_v1 = vmul.f32 %v1460_v59, %v1460_v59  ;;  %v1463_v3 = vadd.f32 %v3286_v0, %v4163_v33  ;;  %v1454_v4 = vpop.f32.mrb[35].mxu0 }
 0x35e   : > { %v1514_v5 = vmul.f32 %v1452_v62, %v1452_v62  ;;  %v1455_v46 = vadd.f32 %v4163_v33, %v1454_v4 }
 0x35f   : > { %v1517_v6 = vmul.f32 %v1463_v3, %v1463_v3  ;;  %v1532_v13 = vmul.f32 -0.5, %v1516_v1 }
 0x360   : > { %v1515_v14 = vmul.f32 %v1455_v46, %v1455_v46  ;;  %v1530_v15 = vmul.f32 -0.5, %v1514_v5 }
 0x361   : > { %v1533_v51 = vmul.f32 -0.5, %v1517_v6 }
 0x362   : > { %v1531_v19 = vmul.f32 -0.5, %v1515_v14 }
 0x363   : > { %v1547_v20 = vpack.c.bf16 %v1533_v51, %v1532_v13 }
 0x364   : > { %v1546_v21 = vpack.c.bf16 %v1531_v19, %v1530_v15 }
 0x365   : > { %v1558_v56 = vmul.bf16 1069105081, %v1547_v20 }
 0x366   : > { %v1555_v26 = vmul.bf16 1069105081, %v1546_v21 }
 0x368   : > { %3530 = vpow.bf16 %v1555_v26 }
 0x369   : > { %3532 = vpow.bf16 %v1558_v56 }
 0x36a   : > { %v3289_v32 = vpop.f32.mrb[36].mxu0 }
 0x36b   : > { %v1476_v38 = vadd.f32 %v3289_v32, %v4163_v33  ;;  %v1467_v39 = vpop.f32.mrb[37].mxu0 }
 0x36c   : > { %v1468_v52 = vadd.f32 %v4163_v33, %v1467_v39  ;;  %v3290_v58 = vpop.f32.mrb[38].mxu0 }
 0x36d   : > { %v1520_v61 = vmul.f32 %v1476_v38, %v1476_v38  ;;  %v1479_v54 = vadd.f32 %v3290_v58, %v4163_v33  ;;  %v1470_v57 = vpop.f32.mrb[39].mxu0 }
 0x36e   : > { %v1518_v59 = vmul.f32 %v1468_v52, %v1468_v52  ;;  %v1471_v60 = vadd.f32 %v4163_v33, %v1470_v57 }
 0x36f   : > { %v1521_v62 = vmul.f32 %v1479_v54, %v1479_v54  ;;  %v1536_v1 = vmul.f32 -0.5, %v1520_v61 }
 0x370   : > { %v1519_v0 = vmul.f32 %v1471_v60, %v1471_v60  ;;  %v1534_v4 = vmul.f32 -0.5, %v1518_v59 }
 0x371   : > { %v1537_v3 = vmul.f32 -0.5, %v1521_v62 }
 0x372   : > { %v1535_v5 = vmul.f32 -0.5, %v1519_v0 }
 0x373   : > { %v3531_v46 = vpop.eup %3530  ;;  %v1549_v6 = vpack.c.bf16 %v1537_v3, %v1536_v1 }
 0x374   : > { %v3533_v14 = vpop.eup %3532  ;;  %v1548_v13 = vpack.c.bf16 %v1535_v5, %v1534_v4  ;;  %3315 = vmatprep.mubr.bf16.mxu1 %v3531_v46 }
 0x375   : > { %v1564_v51 = vmul.bf16 1069105081, %v1549_v6  ;;  %3316 = vmatmul.mubr.bf16.vlgmr.msra.gmra.mrb[32].mxu1 %v3533_v14 }
 0x376   : > { %v1561_v15 = vmul.bf16 1069105081, %v1548_v13 }
 0x378   : > { %3534 = vpow.bf16 %v1561_v15 }
 0x379   : > { %3536 = vpow.bf16 %v1564_v51 }
 0x37a   : > { %v3293_v19 = vpop.f32.mrb[40].mxu0 }
 0x37b   : > { %v1492_v20 = vadd.f32 %v3293_v19, %v4163_v33  ;;  %v1483_v21 = vpop.f32.mrb[41].mxu0 }
 0x37c   : > { %v1484_v56 = vadd.f32 %v4163_v33, %v1483_v21  ;;  %v3294_v26 = vpop.f32.mrb[42].mxu0 }
 0x37d   : > { %v1524_v32 = vmul.f32 %v1492_v20, %v1492_v20  ;;  %v1495_v38 = vadd.f32 %v3294_v26, %v4163_v33  ;;  %v1486_v39 = vpop.f32.mrb[43].mxu0 }
 0x37e   : > { %v1522_v52 = vmul.f32 %v1484_v56, %v1484_v56  ;;  %v1487_v58 = vadd.f32 %v4163_v33, %v1486_v39 }
 0x37f   : > { %v1525_v61 = vmul.f32 %v1495_v38, %v1495_v38  ;;  %v1540_v57 = vmul.f32 -0.5, %v1524_v32 }
 0x380   : > { %v1523_v54 = vmul.f32 %v1487_v58, %v1487_v58  ;;  %v1538_v60 = vmul.f32 -0.5, %v1522_v52 }
 0x381   : > { %v1541_v59 = vmul.f32 -0.5, %v1525_v61 }
 0x382   : > { %v1539_v62 = vmul.f32 -0.5, %v1523_v54 }
 0x383   : > { %v3535_v0 = vpop.eup %3534  ;;  %v1551_v1 = vpack.c.bf16 %v1541_v59, %v1540_v57 }
 0x384   : > { %v3537_v3 = vpop.eup %3536  ;;  %v1550_v4 = vpack.c.bf16 %v1539_v62, %v1538_v60  ;;  %3319 = vmatprep.mubr.bf16.mxu1 %v3535_v0 }
 0x385   : > { %v1570_v5 = vmul.bf16 1069105081, %v1551_v1  ;;  %3320 = vmatmul.mubr.bf16.gmra.mrb[36].mxu1 %v3537_v3 }
 0x386   : > { %v1567_v46 = vmul.bf16 1069105081, %v1550_v4  ;;  %v3448_v4 = vld [vmem:[%s4584_s9 + $0x10] sm:$0xff]  }
 0x388   : > { %3538 = vpow.bf16 %v1567_v46  ;;  %v3450_v46 = vld [vmem:[%s4584_s9 + $0x20] sm:$0xff]  }
 0x389   : > { %3540 = vpow.bf16 %v1570_v5  ;;  %v3449_v5 = vld [vmem:[%s4584_s9 + $0x18] sm:$0xff]  }
 0x38a   : > { %v3297_v6 = vpop.f32.mrb[44].mxu0 }
 0x38b   : > { %v1508_v14 = vadd.f32 %v3297_v6, %v4163_v33  ;;  %v1499_v13 = vpop.f32.mrb[45].mxu0  ;;  %v3451_v6 = vld [vmem:[%s4584_s9 + $0x28] sm:$0xff]  }
 0x38c   : > { %v1500_v51 = vadd.f32 %v4163_v33, %v1499_v13  ;;  %v3298_v15 = vpop.f32.mrb[46].mxu0  ;;  %v3453_v13 = vld [vmem:[%s4584_s9 + $0x38] sm:$0xff]  }
 0x38d   : > { %v1528_v19 = vmul.f32 %v1508_v14, %v1508_v14  ;;  %v1511_v20 = vadd.f32 %v3298_v15, %v4163_v33  ;;  %v1502_v21 = vpop.f32.mrb[47].mxu0  ;;  %v3452_v14 = vld [vmem:[%s4584_s9 + $0x30] sm:$0xff]   ;;  %v3456_v15 = vld [vmem:[%s4586_s11 + $0x4] ss:$8 sps:$4 sm:$0xff]  }
 0x38e   : > { %v1526_v56 = vmul.f32 %v1500_v51, %v1500_v51  ;;  %v1503_v26 = vadd.f32 %v4163_v33, %v1502_v21  ;;  %v3447_v33 = vld [vmem:[%s4584_s9 + $0x8] sm:$0xff]   ;;  %2166 = vmatprep.subr.bf16.mxu1 %v3456_v15 }
 0x38f   : > { %v1529_v32 = vmul.f32 %v1511_v20, %v1511_v20  ;;  %v1544_v39 = vmul.f32 -0.5, %v1528_v19  ;;  %3333 = vmatprep.subr.bf16.mxu0 %v3447_v33  ;;  %v3454_v51 = vld [vmem:[%s4586_s11] ss:$8 sps:$4 sm:$0xff]   ;;  %v3459_v19 = vld [vmem:[%s4586_s11 + $0x14] ss:$8 sps:$4 sm:$0xff]  }
 0x390   : > { %v1527_v38 = vmul.f32 %v1503_v26, %v1503_v26  ;;  %v1542_v58 = vmul.f32 -0.5, %v1526_v56  ;;  %3334 = vmatpush3.bf16.msra.mxu0 %v3447_v33  ;;  %2167 = vmatpush1.bf16.msra.mxu1 %v3454_v51  ;;  %v3457_v20 = vld [vmem:[%s4586_s11 + $0x10] ss:$8 sps:$4 sm:$0xff]   ;;  %v4218_v56 = vld [vmem:[%s4583_s8] ss:$0 sm:$0xff] }
 0x391   : > { %v1545_v52 = vmul.f32 -0.5, %v1529_v32  ;;  %3335 = vmatprep.subr.bf16.mxu0 %v3448_v4  ;;  %2168 = vmatprep.subr.bf16.mxu1 %v3459_v19 }
 0x392   : > { %v1543_v61 = vmul.f32 -0.5, %v1527_v38 }
 0x393   : > { %v3539_v54 = vpop.eup %3538  ;;  %v1553_v57 = vpack.c.bf16 %v1545_v52, %v1544_v39 }
 0x394   : > { %v3541_v59 = vpop.eup %3540  ;;  %v1552_v60 = vpack.c.bf16 %v1543_v61, %v1542_v58  ;;  %3323 = vmatprep.mubr.bf16.mxu1 %v3539_v54  ;;  %3336 = vmatpush3.bf16.msra.mxu0 %v3448_v4 }
 0x395   : > { %v1576_v62 = vmul.bf16 1069105081, %v1553_v57  ;;  %3324 = vmatmul.mubr.bf16.gmra.mrb[40].mxu1 %v3541_v59  ;;  %3337 = vmatprep.subr.bf16.mxu0 %v3449_v5 }
 0x396   : > { %v1573_v0 = vmul.bf16 1069105081, %v1552_v60  ;;  %2169 = vmatpush1.bf16.msra.mxu1 %v3457_v20 }
 0x398   : > { %3542 = vpow.bf16 %v1573_v0  ;;  %3338 = vmatpush3.bf16.msra.mxu0 %v3449_v5 }
 0x399   : > { %3544 = vpow.bf16 %v1576_v62  ;;  %3339 = vmatprep.subr.bf16.mxu0 %v3450_v46 }
 0x39c   : > { %3340 = vmatpush3.bf16.msra.mxu0 %v3450_v46 }
 0x39d   : > { %3341 = vmatprep.subr.bf16.mxu0 %v3451_v6 }
 0x3a0   : > { %3342 = vmatpush3.bf16.msra.mxu0 %v3451_v6 }
 0x3a1   : > { %3343 = vmatprep.subr.bf16.mxu0 %v3452_v14 }
 0x3a3   : > { %v3543_v1 = vpop.eup %3542 }
 0x3a4   : > { %v3545_v3 = vpop.eup %3544  ;;  %3327 = vmatprep.mubr.bf16.mxu1 %v3543_v1  ;;  %3344 = vmatpush3.bf16.msra.mxu0 %v3452_v14 }
 0x3a5   : > { %3328 = vmatmul.mubr.bf16.gmra.mrb[44].mxu1 %v3545_v3  ;;  %3345 = vmatprep.subr.bf16.mxu0 %v3453_v13 }
 0x3a6   : > { %2198 = vmatprep.mubr.bf16.mxu1 %v3683_v10 }
 0x3a8   : > { %3346 = vmatpush3.bf16.msra.mxu0 %v3453_v13 }
 0x448   : > { %v3317_v21 = vpop.f32.mrb[32].mxu1 }
 0x449   : > { %v1685_v26 = vadd.f32 %v3317_v21, %v4107_v11  ;;  %v1676_v32 = vpop.f32.mrb[33].mxu1 }
 0x44a   : > { %v1677_v38 = vadd.f32 %v1676_v32, %v4101_v36  ;;  %v3318_v39 = vpop.f32.mrb[34].mxu1 }
 0x44b   : > { %v1748_v52 = vadd.f32 %v4218_v56, %v1685_v26  ;;  %v1688_v58 = vadd.f32 %v3318_v39, %v4110_v12  ;;  %v1679_v61 = vpop.f32.mrb[35].mxu1 }
 0x44c   : > { %v1746_v54 = vadd.f32 %v4218_v56, %v1677_v38  ;;  %v1680_v57 = vadd.f32 %v1679_v61, %v4104_v7 }
 0x44d   : > { %v1764_v59 = vmul.f32 %v1748_v52, %v1748_v52  ;;  %v1749_v60 = vadd.f32 %v4218_v56, %v1688_v58 }
 0x44e   : > { %v1762_v62 = vmul.f32 %v1746_v54, %v1746_v54  ;;  %v1747_v0 = vadd.f32 %v4218_v56, %v1680_v57 }
 0x44f   : > { %v1765_v11 = vmul.f32 %v1749_v60, %v1749_v60  ;;  %v1780_v3 = vmul.f32 -0.5, %v1764_v59 }
 0x450   : > { %v1763_v1 = vmul.f32 %v1747_v0, %v1747_v0  ;;  %v1778_v33 = vmul.f32 -0.5, %v1762_v62 }
 0x451   : > { %v1781_v36 = vmul.f32 -0.5, %v1765_v11 }
 0x452   : > { %v1779_v4 = vmul.f32 -0.5, %v1763_v1 }
 0x453   : > { %v1795_v5 = vpack.c.bf16 %v1781_v36, %v1780_v3 }
 0x454   : > { %v1794_v46 = vpack.c.bf16 %v1779_v4, %v1778_v33 }
 0x455   : > { %v1806_v12 = vmul.bf16 1069105081, %v1795_v5 }
 0x456   : > { %v1803_v6 = vmul.bf16 1069105081, %v1794_v46 }
 0x458   : > { %3546 = vpow.bf16 %v1803_v6  ;;  %v3321_v14 = vpop.f32.mrb[36].mxu1 }
 0x459   : > { %3548 = vpow.bf16 %v1806_v12  ;;  %v1701_v7 = vadd.f32 %v3321_v14, %v4119_v53  ;;  %v1692_v13 = vpop.f32.mrb[37].mxu1 }
 0x45a   : > { %v1693_v51 = vadd.f32 %v1692_v13, %v4113_v27  ;;  %v3322_v15 = vpop.f32.mrb[38].mxu1 }
 0x45b   : > { %v1752_v19 = vadd.f32 %v4218_v56, %v1701_v7  ;;  %v1704_v20 = vadd.f32 %v3322_v15, %v4122_v2  ;;  %v1695_v21 = vpop.f32.mrb[39].mxu1 }
 0x45c   : > { %v1750_v26 = vadd.f32 %v4218_v56, %v1693_v51  ;;  %v1696_v32 = vadd.f32 %v1695_v21, %v4116_v29 }
 0x45d   : > { %v1768_v38 = vmul.f32 %v1752_v19, %v1752_v19  ;;  %v1753_v39 = vadd.f32 %v4218_v56, %v1704_v20 }
 0x45e   : > { %v1766_v52 = vmul.f32 %v1750_v26, %v1750_v26  ;;  %v1751_v58 = vadd.f32 %v4218_v56, %v1696_v32 }
 0x45f   : > { %v1769_v53 = vmul.f32 %v1753_v39, %v1753_v39  ;;  %v1784_v54 = vmul.f32 -0.5, %v1768_v38 }
 0x460   : > { %v1767_v61 = vmul.f32 %v1751_v58, %v1751_v58  ;;  %v1782_v57 = vmul.f32 -0.5, %v1766_v52 }
 0x461   : > { %v1785_v27 = vmul.f32 -0.5, %v1769_v53 }
 0x462   : > { %v1783_v59 = vmul.f32 -0.5, %v1767_v61 }
 0x463   : > { %v3547_v60 = vpop.eup %3546  ;;  %v1797_v62 = vpack.c.bf16 %v1785_v27, %v1784_v54 }
 0x464   : > { %v3549_v2 = vpop.eup %3548  ;;  %v1796_v0 = vpack.c.bf16 %v1783_v59, %v1782_v57  ;;  %3347 = vmatprep.mubr.bf16.mxu0 %v3547_v60 }
 0x465   : > { %v1812_v11 = vmul.bf16 1069105081, %v1797_v62  ;;  %3348 = vmatmul.mubr.bf16.vlgmr.msra.gmra.mrb[48].mxu0 %v3549_v2 }
 0x466   : > { %v1809_v29 = vmul.bf16 1069105081, %v1796_v0 }
 0x468   : > { %3550 = vpow.bf16 %v1809_v29  ;;  %v3325_v1 = vpop.f32.mrb[40].mxu1 }
 0x469   : > { %3552 = vpow.bf16 %v1812_v11  ;;  %v1717_v3 = vadd.f32 %v3325_v1, %v4131_v18  ;;  %v1708_v36 = vpop.f32.mrb[41].mxu1  ;;  %v845_v18 = vpop.xlane.xlu1 %844 }
 0x46a   : > { %v1709_v33 = vadd.f32 %v1708_v36, %v4125_v41  ;;  %v3326_v4 = vpop.f32.mrb[42].mxu1  ;;  %v843_v41 = vpop.xlane.xlu0 %842  ;;  %v875_v32 = vmul.f32 0.0078125, %v845_v18 }
 0x46b   : > { %v1756_v5 = vadd.f32 %v4218_v56, %v1717_v3  ;;  %v1720_v46 = vadd.f32 %v3326_v4, %v4134_v30  ;;  %v1711_v12 = vpop.f32.mrb[43].mxu1  ;;  %v874_v53 = vmul.f32 0.0078125, %v843_v41 }
 0x46c   : > { %v1754_v6 = vadd.f32 %v4218_v56, %v1709_v33  ;;  %v1712_v14 = vadd.f32 %v1711_v12, %v4128_v8  ;;  %v971_v54 = vsub.f32 %v875_v32, %v3982_v24 }
 0x46d   : > { %v1772_v7 = vmul.f32 %v1756_v5, %v1756_v5  ;;  %v1757_v13 = vadd.f32 %v4218_v56, %v1720_v46  ;;  %v970_v57 = vsub.f32 %v874_v53, %v3974_v35  ;;  %v3466_v53 = vld [vmem:[%s4586_s11 + $0x40] ss:$8 sps:$4 sm:$0xff]  }
 0x46e   : > { %v1770_v51 = vmul.f32 %v1754_v6, %v1754_v6  ;;  %v1755_v15 = vadd.f32 %v4218_v56, %v1712_v14  ;;  %v987_v2 = vmul.f32 %v971_v54, %v971_v54  ;;  %v3474_v54 = vld [vmem:[%s4586_s11 + $0x64] ss:$8 sps:$4 sm:$0xff]  }
 0x46f   : > { %v1773_v19 = vmul.f32 %v1757_v13, %v1757_v13  ;;  %v1788_v21 = vmul.f32 -0.5, %v1772_v7  ;;  %v986_v36 = vmul.f32 %v970_v57, %v970_v57  ;;  %v3477_v57 = vld [vmem:[%s4586_s11 + $0x74] ss:$8 sps:$4 sm:$0xff]  }
 0x470   : > { %v1771_v20 = vmul.f32 %v1755_v15, %v1755_v15  ;;  %v1786_v38 = vmul.f32 -0.5, %v1770_v51  ;;  %v1003_v5 = vmul.f32 -0.5, %v987_v2  ;;  %v3480_v2 = vld [vmem:[%s4588_s13 + $0x48] sm:$0xff]  }
 0x471   : > { %v1789_v26 = vmul.f32 -0.5, %v1773_v19 }
 0x472   : > { %v1787_v30 = vmul.f32 -0.5, %v1771_v20 }
 0x473   : > { %v3551_v39 = vpop.eup %3550  ;;  %v1799_v52 = vpack.c.bf16 %v1789_v26, %v1788_v21 }
 0x474   : > { %v3553_v58 = vpop.eup %3552  ;;  %v1798_v8 = vpack.c.bf16 %v1787_v30, %v1786_v38  ;;  %3351 = vmatprep.mubr.bf16.mxu0 %v3551_v39  ;;  %v3462_v38 = vld [vmem:[%s4586_s11 + $0x24] ss:$8 sps:$4 sm:$0xff]   ;;  %v3460_v30 = vld [vmem:[%s4586_s11 + $0x20] ss:$8 sps:$4 sm:$0xff]   ;;  %v3465_v39 = vld [vmem:[%s4586_s11 + $0x34] ss:$8 sps:$4 sm:$0xff]  }
 0x475   : > { %v1818_v61 = vmul.bf16 1069105081, %v1799_v52  ;;  %3352 = vmatmul.mubr.bf16.gmra.mrb[52].mxu0 %v3553_v58  ;;  %2170 = vmatprep.subr.bf16.mxu1 %v3462_v38  ;;  %v3463_v52 = vld [vmem:[%s4586_s11 + $0x30] ss:$8 sps:$4 sm:$0xff]   ;;  %v3468_v58 = vld [vmem:[%s4586_s11 + $0x44] ss:$8 sps:$4 sm:$0xff]  }
 0x476   : > { %v1815_v27 = vmul.bf16 1069105081, %v1798_v8  ;;  %2171 = vmatpush1.bf16.msra.mxu1 %v3460_v30  ;;  %v3471_v8 = vld [vmem:[%s4586_s11 + $0x54] ss:$8 sps:$4 sm:$0xff]  }
 0x477   : > { %2172 = vmatprep.subr.bf16.mxu1 %v3465_v39 }
 0x478   : > { %3554 = vpow.bf16 %v1815_v27  ;;  %v3329_v59 = vpop.f32.mrb[44].mxu1  ;;  %v3472_v27 = vld [vmem:[%s4586_s11 + $0x60] ss:$8 sps:$4 sm:$0xff]  }
 0x479   : > { %3556 = vpow.bf16 %v1818_v61  ;;  %v1733_v60 = vadd.f32 %v3329_v59, %v4143_v9  ;;  %v1724_v62 = vpop.f32.mrb[45].mxu1  ;;  %v3469_v61 = vld [vmem:[%s4586_s11 + $0x50] ss:$8 sps:$4 sm:$0xff]  }
 0x47a   : > { %v1725_v0 = vadd.f32 %v1724_v62, %v4137_v55  ;;  %v3330_v11 = vpop.f32.mrb[46].mxu1  ;;  %v1002_v55 = vmul.f32 -0.5, %v986_v36  ;;  %2173 = vmatpush1.bf16.msra.mxu1 %v3463_v52  ;;  %v3475_v59 = vld [vmem:[%s4586_s11 + $0x70] ss:$8 sps:$4 sm:$0xff]   ;;  %v3479_v62 = vld [vmem:[%s4588_s13] sm:$0xff]  }
 0x47b   : > { %v1760_v29 = vadd.f32 %v4218_v56, %v1733_v60  ;;  %v1736_v1 = vadd.f32 %v3330_v11, %v4146_v16  ;;  %v1727_v3 = vpop.f32.mrb[47].mxu1  ;;  %2174 = vmatprep.subr.bf16.mxu1 %v3468_v58  ;;  %v3478_v60 = vld [vmem:[%s4588_s13 + $0x40] sm:$0xff]   ;;  %v3482_v11 = vld [vmem:[%s4588_s13 + $0x50] sm:$0xff]  }
 0x47c   : > { %v1758_v24 = vadd.f32 %v4218_v56, %v1725_v0  ;;  %v1728_v35 = vadd.f32 %v1727_v3, %v4140_v63  ;;  %v1018_v13 = vpack.c.bf16 %v1003_v5, %v1002_v55  ;;  %3191 = vmatprep.subr.bf16.mxu0 %v3478_v60  ;;  %v3481_v0 = vld [vmem:[%s4588_s13 + $0x8] sm:$0xff]   ;;  %v3485_v3 = vld [vmem:[%s4588_s13 + $0x18] sm:$0xff]   ;;  %v3486_v36 = vld [vmem:[%s4588_s13 + $0x60] sm:$0xff]  }
 0x47d   : > { %v1776_v33 = vmul.f32 %v1760_v29, %v1760_v29  ;;  %v1761_v4 = vadd.f32 %v4218_v56, %v1736_v1  ;;  %3192 = vmatpush3.bf16.msra.mxu0 %v3479_v62  ;;  %v3483_v29 = vld [vmem:[%s4588_s13 + $0x10] sm:$0xff]   ;;  %v3484_v1 = vld [vmem:[%s4588_s13 + $0x58] sm:$0xff]  }
 0x47e   : > { %v1774_v9 = vmul.f32 %v1758_v24, %v1758_v24  ;;  %v1759_v46 = vadd.f32 %v4218_v56, %v1728_v35  ;;  %v1027_v41 = vmul.bf16 1069105081, %v1018_v13  ;;  %2175 = vmatpush1.bf16.msra.mxu1 %v3466_v53  ;;  %3193 = vmatprep.subr.bf16.mxu0 %v3480_v2  ;;  %v3487_v24 = vld [vmem:[%s4588_s13 + $0x20] sm:$0xff]   ;;  %v3488_v35 = vld [vmem:[%s4588_s13 + $0x68] sm:$0xff]   ;;  %v3491_v5 = vld [vmem:[%s4588_s13 + $0x30] sm:$0xff]  }
 0x47f   : > { %v1777_v12 = vmul.f32 %v1761_v4, %v1761_v4  ;;  %v1792_v14 = vmul.f32 -0.5, %v1776_v33  ;;  %2176 = vmatprep.subr.bf16.mxu1 %v3471_v8  ;;  %v3489_v33 = vld [vmem:[%s4588_s13 + $0x28] sm:$0xff]   ;;  %v3490_v4 = vld [vmem:[%s4588_s13 + $0x70] sm:$0xff]  }
 0x480   : > { %v1775_v6 = vmul.f32 %v1759_v46, %v1759_v46  ;;  %v1790_v16 = vmul.f32 -0.5, %v1774_v9  ;;  %v4335_v9 = vld [vmem:[%s4585_s10] ss:$0 sm:$0xff] }
 0x481   : > { %v1793_v7 = vmul.f32 -0.5, %v1777_v12  ;;  %3194 = vmatpush3.bf16.msra.mxu0 %v3481_v0 }
 0x482   : > { %v1791_v51 = vmul.f32 -0.5, %v1775_v6  ;;  %2177 = vmatpush1.bf16.msra.mxu1 %v3469_v61  ;;  %3195 = vmatprep.subr.bf16.mxu0 %v3482_v11 }
 0x483   : > { %v3555_v15 = vpop.eup %3554  ;;  %v1801_v18 = vpack.c.bf16 %v1793_v7, %v1792_v14  ;;  %2178 = vmatprep.subr.bf16.mxu1 %v3474_v54 }
 0x484   : > { %v3557_v19 = vpop.eup %3556  ;;  %v1800_v20 = vpack.c.bf16 %v1791_v51, %v1790_v16  ;;  %3355 = vmatprep.mubr.bf16.mxu0 %v3555_v15 }
 0x485   : > { %v1824_v63 = vmul.bf16 1069105081, %v1801_v18  ;;  %3356 = vmatmul.mubr.bf16.gmra.mrb[56].mxu0 %v3557_v19 }
 0x486   : > { %v1821_v21 = vmul.bf16 1069105081, %v1800_v20  ;;  %2179 = vmatpush1.bf16.msra.mxu1 %v3472_v27  ;;  %3196 = vmatpush3.bf16.msra.mxu0 %v3483_v29 }
 0x487   : > { %2180 = vmatprep.subr.bf16.mxu1 %v3477_v57  ;;  %3197 = vmatprep.subr.bf16.mxu0 %v3484_v1 }
 0x488   : > { %3558 = vpow.bf16 %v1821_v21 }
 0x489   : > { %3560 = vpow.bf16 %v1824_v63 }
 0x48a   : > { %3562 = vpow.bf16 %v1027_v41  ;;  %2181 = vmatpush1.bf16.msra.mxu1 %v3475_v59  ;;  %3198 = vmatpush3.bf16.msra.mxu0 %v3485_v3 }
 0x48b   : > { %3199 = vmatprep.subr.bf16.mxu0 %v3486_v36 }
 0x48e   : > { %3200 = vmatpush3.bf16.msra.mxu0 %v3487_v24 }
 0x48f   : > { %3201 = vmatprep.subr.bf16.mxu0 %v3488_v35 }
 0x492   : > { %3202 = vmatpush3.bf16.msra.mxu0 %v3489_v33 }
 0x493   : > { %v3559_v56 = vpop.eup %3558  ;;  %3203 = vmatprep.subr.bf16.mxu0 %v3490_v4 }
 0x494   : > { %v3561_v26 = vpop.eup %3560  ;;  %3359 = vmatprep.mubr.bf16.mxu0 %v3559_v56 }
 0x495   : > { %v3563_v32 = vpop.eup %3562  ;;  %3360 = vmatmul.mubr.bf16.gmra.mrb[60].mxu0 %v3561_v26 }
 0x496   : > { %2454 = vmatprep.mubr.bf16.mxu0 %v3563_v32  ;;  %3204 = vmatpush3.bf16.msra.mxu0 %v3491_v5 }
 0x538   : > { %v3349_v46 = vpop.f32.mrb[48].mxu0 }
 0x539   : > { %v1940_v12 = vadd.f32 %v3349_v46, %v4335_v9  ;;  %v1931_v55 = vpop.f32.mrb[49].mxu0 }
 0x53a   : > { %v1932_v6 = vadd.f32 %v4335_v9, %v1931_v55  ;;  %v3350_v14 = vpop.f32.mrb[50].mxu0 }
 0x53b   : > { %v1996_v7 = vmul.f32 %v1940_v12, %v1940_v12  ;;  %v1943_v13 = vadd.f32 %v3350_v14, %v4335_v9  ;;  %v1934_v16 = vpop.f32.mrb[51].mxu0 }
 0x53c   : > { %v1994_v51 = vmul.f32 %v1932_v6, %v1932_v6  ;;  %v1935_v15 = vadd.f32 %v4335_v9, %v1934_v16 }
 0x53d   : > { %v1997_v18 = vmul.f32 %v1943_v13, %v1943_v13  ;;  %v2012_v20 = vmul.f32 -0.5, %v1996_v7 }
 0x53e   : > { %v1995_v19 = vmul.f32 %v1935_v15, %v1935_v15  ;;  %v2010_v41 = vmul.f32 -0.5, %v1994_v51 }
 0x53f   : > { %v2013_v63 = vmul.f32 -0.5, %v1997_v18 }
 0x540   : > { %v2011_v21 = vmul.f32 -0.5, %v1995_v19 }
 0x541   : > { %v2027_v56 = vpack.c.bf16 %v2013_v63, %v2012_v20 }
 0x542   : > { %v2026_v26 = vpack.c.bf16 %v2011_v21, %v2010_v41 }
 0x543   : > { %v2038_v52 = vmul.bf16 1069105081, %v2027_v56 }
 0x544   : > { %v2035_v32 = vmul.bf16 1069105081, %v2026_v26 }
 0x546   : > { %3564 = vpow.bf16 %v2035_v32 }
 0x547   : > { %3566 = vpow.bf16 %v2038_v52 }
 0x548   : > { %v3353_v38 = vpop.f32.mrb[52].mxu0 }
 0x549   : > { %v1956_v30 = vadd.f32 %v3353_v38, %v4335_v9  ;;  %v1947_v39 = vpop.f32.mrb[53].mxu0 }
 0x54a   : > { %v1948_v58 = vadd.f32 %v4335_v9, %v1947_v39  ;;  %v3354_v53 = vpop.f32.mrb[54].mxu0 }
 0x54b   : > { %v2000_v8 = vmul.f32 %v1956_v30, %v1956_v30  ;;  %v1959_v61 = vadd.f32 %v3354_v53, %v4335_v9  ;;  %v1950_v54 = vpop.f32.mrb[55].mxu0 }
 0x54c   : > { %v1998_v27 = vmul.f32 %v1948_v58, %v1948_v58  ;;  %v1951_v57 = vadd.f32 %v4335_v9, %v1950_v54 }
 0x54d   : > { %v2001_v59 = vmul.f32 %v1959_v61, %v1959_v61  ;;  %v2016_v62 = vmul.f32 -0.5, %v2000_v8 }
 0x54e   : > { %v1999_v60 = vmul.f32 %v1951_v57, %v1951_v57  ;;  %v2014_v0 = vmul.f32 -0.5, %v1998_v27 }
 0x54f   : > { %v2017_v2 = vmul.f32 -0.5, %v2001_v59 }
 0x550   : > { %v2015_v11 = vmul.f32 -0.5, %v1999_v60 }
 0x551   : > { %v3565_v29 = vpop.eup %3564  ;;  %v2029_v1 = vpack.c.bf16 %v2017_v2, %v2016_v62 }
 0x552   : > { %v2028_v3 = vpack.c.bf16 %v2015_v11, %v2014_v0  ;;  %2199 = vmatmul.mubr.bf16.vlgmr.msra.gmra.mrb[48].mxu1 %v3565_v29  ;;  %v3567_v35 = vpop.eup %3566 }
 0x553   : > { %2208 = vmatprep.mubr.bf16.mxu1 %v3683_v10  ;;  %v2044_v5 = vmul.bf16 1069105081, %v2029_v1 }
 0x554   : > { %v2041_v36 = vmul.bf16 1069105081, %v2028_v3 }
 0x556   : > { %3568 = vpow.bf16 %v2041_v36 }
 0x557   : > { %3570 = vpow.bf16 %v2044_v5  ;;  %v849_v5 = vpop.xlane.xlu1 %848 }
 0x558   : > { %v3357_v24 = vpop.f32.mrb[56].mxu0 }
 0x559   : > { %v1972_v33 = vadd.f32 %v3357_v24, %v4335_v9  ;;  %v1963_v4 = vpop.f32.mrb[57].mxu0 }
 0x55a   : > { %v1964_v46 = vadd.f32 %v4335_v9, %v1963_v4  ;;  %v3358_v12 = vpop.f32.mrb[58].mxu0  ;;  %2209 = vmatmul.mubr.bf16.gmra.mrb[52].mxu1 %v3567_v35  ;;  %v3493_v4 = vld [vmem:[%s4588_s13 + $0x38] sm:$0xff]  }
 0x55b   : > { %v2004_v55 = vmul.f32 %v1972_v33, %v1972_v33  ;;  %v1975_v6 = vadd.f32 %v3358_v12, %v4335_v9  ;;  %v1966_v14 = vpop.f32.mrb[59].mxu0  ;;  %2218 = vmatprep.mubr.bf16.mxu1 %v3683_v10  ;;  %v3492_v33 = vld [vmem:[%s4588_s13 + $0x78] sm:$0xff]   ;;  %v877_v12 = vmul.f32 0.0078125, %v849_v5 }
 0x55c   : > { %v2002_v7 = vmul.f32 %v1964_v46, %v1964_v46  ;;  %v1967_v13 = vadd.f32 %v4335_v9, %v1966_v14  ;;  %3205 = vmatprep.subr.bf16.mxu0 %v3492_v33  ;;  %v847_v46 = vpop.xlane.xlu0 %846  ;;  %v853_v14 = vpop.xlane.xlu1 %852 }
 0x55d   : > { %v2005_v16 = vmul.f32 %v1975_v6, %v1975_v6  ;;  %v2020_v15 = vmul.f32 -0.5, %v2004_v55  ;;  %3206 = vmatpush3.bf16.msra.mxu0 %v3493_v4  ;;  %v876_v55 = vmul.f32 0.0078125, %v847_v46  ;;  %v973_v6 = vsub.f32 %v877_v12, %v3990_v28 }
 0x55e   : > { %v2003_v51 = vmul.f32 %v1967_v13, %v1967_v13  ;;  %v2018_v19 = vmul.f32 -0.5, %v2002_v7 }
 0x55f   : > { %v2021_v18 = vmul.f32 -0.5, %v2005_v16  ;;  %v989_v13 = vmul.f32 %v973_v6, %v973_v6  ;;  %v879_v16 = vmul.f32 0.0078125, %v853_v14 }
 0x560   : > { %v2019_v20 = vmul.f32 -0.5, %v2003_v51  ;;  %v851_v7 = vpop.xlane.xlu0 %850 }
 0x561   : > { %v3569_v63 = vpop.eup %3568  ;;  %v2031_v41 = vpack.c.bf16 %v2021_v18, %v2020_v15  ;;  %v878_v15 = vmul.f32 0.0078125, %v851_v7  ;;  %v1005_v18 = vmul.f32 -0.5, %v989_v13 }
 0x562   : > { %v2030_v21 = vpack.c.bf16 %v2019_v20, %v2018_v19  ;;  %2219 = vmatmul.mubr.bf16.gmra.mrb[56].mxu1 %v3569_v63  ;;  %v3571_v32 = vpop.eup %3570  ;;  %v975_v19 = vsub.f32 %v879_v16, %v3998_v31  ;;  %v857_v20 = vpop.xlane.xlu1 %856 }
 0x563   : > { %2228 = vmatprep.mubr.bf16.mxu1 %v3683_v10  ;;  %v2050_v39 = vmul.bf16 1069105081, %v2031_v41  ;;  %v974_v41 = vsub.f32 %v878_v15, %v3993_v25  ;;  %v2074_v25 = vld [vmem:[%s4587_s12] sm:$0x3] }
 0x564   : > { %v2047_v56 = vmul.bf16 1069105081, %v2030_v21  ;;  %v855_v21 = vpop.xlane.xlu0 %854 }
 0x565   : > { %v990_v28 = vmul.f32 %v974_v41, %v974_v41 }
 0x566   : > { %3572 = vpow.bf16 %v2047_v56 }
 0x567   : > { %3574 = vpow.bf16 %v2050_v39 }
 0x568   : > { %v3361_v26 = vpop.f32.mrb[60].mxu0 }
 0x569   : > { %v1988_v38 = vadd.f32 %v3361_v26, %v4335_v9  ;;  %v1979_v30 = vpop.f32.mrb[61].mxu0  ;;  %v991_v26 = vmul.f32 %v975_v19, %v975_v19 }
 0x56a   : > { %v1980_v52 = vadd.f32 %v4335_v9, %v1979_v30  ;;  %v3362_v58 = vpop.f32.mrb[62].mxu0  ;;  %2229 = vmatmul.mubr.bf16.gmra.mrb[60].mxu1 %v3571_v32  ;;  %v881_v32 = vmul.f32 0.0078125, %v857_v20 }
 0x56b   : > { %v2008_v53 = vmul.f32 %v1988_v38, %v1988_v38  ;;  %v1991_v8 = vadd.f32 %v3362_v58, %v4335_v9  ;;  %v1982_v61 = vpop.f32.mrb[63].mxu0  ;;  %2238 = vmatprep.mubr.bf16.mxu1 %v3683_v10  ;;  %v880_v38 = vmul.f32 0.0078125, %v855_v21  ;;  %v1006_v58 = vmul.f32 -0.5, %v990_v28 }
 0x56c   : > { %v2006_v54 = vmul.f32 %v1980_v52, %v1980_v52  ;;  %v1983_v27 = vadd.f32 %v4335_v9, %v1982_v61  ;;  %v977_v39 = vsub.f32 %v881_v32, %v4006_v37  ;;  %v861_v52 = vpop.xlane.xlu1 %860 }
 0x56d   : > { %v2009_v57 = vmul.f32 %v1991_v8, %v1991_v8  ;;  %v2024_v60 = vmul.f32 -0.5, %v2008_v53  ;;  %v976_v53 = vsub.f32 %v880_v38, %v4001_v34  ;;  %v859_v8 = vpop.xlane.xlu0 %858  ;;  %v883_v31 = vmul.f32 0.0078125, %v861_v52 }
 0x56e   : > { %v2007_v59 = vmul.f32 %v1983_v27, %v1983_v27  ;;  %v2022_v2 = vmul.f32 -0.5, %v2006_v54  ;;  %v993_v54 = vmul.f32 %v977_v39, %v977_v39  ;;  %v882_v27 = vmul.f32 0.0078125, %v859_v8 }
 0x56f   : > { %v2025_v62 = vmul.f32 -0.5, %v2009_v57  ;;  %v992_v57 = vmul.f32 %v976_v53, %v976_v53  ;;  %v979_v37 = vsub.f32 %v883_v31, %v4012_v42  ;;  %v4382_v34 = vrot.slane %v2074_v25, %v575_v23 }
 0x570   : > { %v2023_v0 = vmul.f32 -0.5, %v2007_v59  ;;  %v4377_v59 = vrot.slane %v2074_v25, %v579_v17 }
 0x571   : > { %v3573_v11 = vpop.eup %3572  ;;  %v2033_v29 = vpack.c.bf16 %v2025_v62, %v2024_v60  ;;  %v1009_v62 = vmul.f32 -0.5, %v993_v54  ;;  %v995_v17 = vmul.f32 %v979_v37, %v979_v37 }
 0x572   : > { %v2032_v1 = vpack.c.bf16 %v2023_v0, %v2022_v2  ;;  %2239 = vmatmul.mubr.bf16.gmra.mrb[64].mxu1 %v3573_v11  ;;  %v3575_v36 = vpop.eup %3574  ;;  %v865_v2 = vpop.xlane.xlu1 %864  ;;  %v978_v11 = vsub.f32 %v882_v27, %v4008_v43 }
 0x573   : > { %2248 = vmatprep.mubr.bf16.mxu1 %v3683_v10  ;;  %v2056_v24 = vmul.bf16 1069105081, %v2033_v29  ;;  %v1011_v6 = vmul.f32 -0.5, %v995_v17 }
 0x574   : > { %v2053_v3 = vmul.bf16 1069105081, %v2032_v1  ;;  %v1008_v1 = vmul.f32 -0.5, %v992_v57  ;;  %v994_v5 = vmul.f32 %v978_v11, %v978_v11 }
 0x576   : > { %3576 = vpow.bf16 %v2053_v3  ;;  %v863_v3 = vpop.xlane.xlu0 %862  ;;  %v1010_v13 = vmul.f32 -0.5, %v994_v5 }
 0x577   : > { %3578 = vpow.bf16 %v2056_v24  ;;  %v884_v43 = vmul.f32 0.0078125, %v863_v3 }
 0x578   : > { %v1022_v20 = vpack.c.bf16 %v1011_v6, %v1010_v13 }
 0x579   : > { %v980_v16 = vsub.f32 %v884_v43, %v4014_v44 }
 0x57a   : > { %2249 = vmatmul.mubr.bf16.gmra.mrb[68].mxu1 %v3575_v36  ;;  %v867_v41 = vpop.xlane.xlu0 %866  ;;  %v1039_v39 = vmul.bf16 1069105081, %v1022_v20 }
 0x57b   : > { %2258 = vmatprep.mubr.bf16.mxu1 %v3683_v10  ;;  %v996_v38 = vmul.f32 %v980_v16, %v980_v16 }
 0x57d   : > { %v1012_v31 = vmul.f32 -0.5, %v996_v38 }
 0x581   : > { %v3577_v9 = vpop.eup %3576 }
 0x582   : > { %2259 = vmatmul.mubr.bf16.gmra.mrb[72].mxu1 %v3577_v9  ;;  %v3579_v35 = vpop.eup %3578  ;;  %v885_v9 = vmul.f32 0.0078125, %v865_v2 }
 0x583   : > { %2268 = vmatprep.mubr.bf16.mxu1 %v3683_v10  ;;  %v972_v10 = vsub.f32 %v876_v55, %v3985_v40  ;;  %v1007_v40 = vmul.f32 -0.5, %v991_v26 }
 0x584   : > { %v981_v14 = vsub.f32 %v885_v9, %v4018_v45 }
 0x585   : > { %v988_v51 = vmul.f32 %v972_v10, %v972_v10  ;;  %v1020_v61 = vpack.c.bf16 %v1007_v40, %v1006_v58 }
 0x587   : > { %v1004_v63 = vmul.f32 -0.5, %v988_v51  ;;  %v1033_v60 = vmul.bf16 1069105081, %v1020_v61  ;;  %v869_v51 = vpop.xlane.xlu1 %868 }
 0x588   : > { %v887_v26 = vmul.f32 0.0078125, %v869_v51 }
 0x589   : > { %v1019_v56 = vpack.c.bf16 %v1005_v18, %v1004_v63  ;;  %v997_v63 = vmul.f32 %v981_v14, %v981_v14 }
 0x58a   : > { %2269 = vmatmul.mubr.bf16.gmra.mrb[76].mxu1 %v3579_v35  ;;  %v1021_v35 = vpack.c.bf16 %v1009_v62, %v1008_v1  ;;  %v983_v58 = vsub.f32 %v887_v26, %v4024_v48 }
 0x58b   : > { %v1030_v30 = vmul.bf16 1069105081, %v1019_v56  ;;  %v1013_v52 = vmul.f32 -0.5, %v997_v63  ;;  %v873_v25 = vpop.xlane.xlu1 %872 }
 0x58c   : > { %v1036_v10 = vmul.bf16 1069105081, %v1021_v35  ;;  %v889_v11 = vmul.f32 0.0078125, %v873_v25 }
 0x58d   : > { %3580 = vpow.bf16 %v1030_v30  ;;  %v886_v30 = vmul.f32 0.0078125, %v867_v41  ;;  %v1023_v37 = vpack.c.bf16 %v1013_v52, %v1012_v31 }
 0x58e   : > { %3582 = vpow.bf16 %v1033_v60  ;;  %v871_v60 = vpop.xlane.xlu0 %870 }
 0x58f   : > { %3584 = vpow.bf16 %v1036_v10  ;;  %v982_v54 = vsub.f32 %v886_v30, %v4020_v47  ;;  %v1042_v9 = vmul.bf16 1069105081, %v1023_v37 }
 0x590   : > { %3586 = vpow.bf16 %v1039_v39 }
 0x591   : > { %v998_v47 = vmul.f32 %v982_v54, %v982_v54  ;;  %3588 = vpow.bf16 %v1042_v9 }
 0x598   : > { %v3581_v55 = vpop.eup %3580 }
 0x599   : > { %v3583_v40 = vpop.eup %3582 }
 0x59a   : > { %v3585_v17 = vpop.eup %3584 }
 0x59b   : > { %v3587_v13 = vpop.eup %3586 }
 0x625   : > { %v2200_v0 = vpop.f32.mrb[48].mxu1 }
 0x626   : > { %v2202_v29 = vpop.f32.mrb[49].mxu1  ;;  %v2201_v42 = vadd.f32 %v2200_v0, %v4382_v34  ;;  %v999_v0 = vmul.f32 %v983_v58, %v983_v58 }
 0x627   : > { %v2203_v36 = vadd.f32 %v2202_v29, %v4377_v59  ;;  %v2204_v24 = vpop.f32.mrb[50].mxu1 }
 0x628   : > { %v2205_v22 = vadd.f32 %v2204_v24, %v4382_v34  ;;  %v2206_v23 = vpop.f32.mrb[51].mxu1 }
 0x629   : > { %v2840_v33 = vmax.f32 %v2203_v36, 0.0  ;;  %v2207_v4 = vadd.f32 %v2206_v23, %v4377_v59  ;;  %v888_v36 = vmul.f32 0.0078125, %v871_v60 }
 0x62a   : > { %v2279_v46 = vpack.c.bf16 %v2205_v22, %v2201_v42  ;;  %v1015_v42 = vmul.f32 -0.5, %v999_v0  ;;  %v985_v22 = vsub.f32 %v889_v11, %v4030_v50 }
 0x62b   : > { %v2841_v12 = vmax.f32 %v2207_v4, 0.0  ;;  %2889 = vrot.lane.b32.xlu0 %v2840_v33, %s3684_s25  ;;  %v1014_v33 = vmul.f32 -0.5, %v998_v47  ;;  %v984_v4 = vsub.f32 %v888_v36, %v4026_v49 }
 0x62c   : > { %2455 = vmatmul.mubr.bf16.vlgmr.msra.gmra.mrb[64].mxu0 %v2279_v46  ;;  %v1001_v14 = vmul.f32 %v985_v22, %v985_v22 }
 0x62d   : > { %v2210_v7 = vpop.f32.mrb[52].mxu1  ;;  %2891 = vrot.lane.b32.xlu1 %v2841_v12, %s3684_s25  ;;  %2462 = vmatprep.mubr.bf16.mxu0 %v3581_v55  ;;  %v1024_v6 = vpack.c.bf16 %v1015_v42, %v1014_v33  ;;  %v1000_v16 = vmul.f32 %v984_v4, %v984_v4 }
 0x62e   : > { %v2212_v15 = vpop.f32.mrb[53].mxu1  ;;  %v2211_v21 = vadd.f32 %v2210_v7, %v4382_v34 }
 0x62f   : > { %v2213_v18 = vadd.f32 %v2212_v15, %v4377_v59  ;;  %v2214_v19 = vpop.f32.mrb[54].mxu1  ;;  %v1045_v49 = vmul.bf16 1069105081, %v1024_v6  ;;  %v1017_v15 = vmul.f32 -0.5, %v1001_v14  ;;  %v1016_v20 = vmul.f32 -0.5, %v1000_v16 }
 0x630   : > { %v2215_v45 = vadd.f32 %v2214_v19, %v4382_v34  ;;  %v2216_v56 = vpop.f32.mrb[55].mxu1  ;;  %v4454_v14 = vld [vmem:[%s4589_s14] ss:$0 sm:$0xff] }
 0x631   : > { %v2842_v32 = vmax.f32 %v2213_v18, 0.0  ;;  %v2217_v28 = vadd.f32 %v2216_v56, %v4377_v59  ;;  %3590 = vpow.bf16 %v1045_v49  ;;  %v1025_v26 = vpack.c.bf16 %v1017_v15, %v1016_v20 }
 0x632   : > { %v2280_v44 = vpack.c.bf16 %v2215_v45, %v2211_v21 }
 0x633   : > { %2893 = vrot.lane.b32.xlu1 %v2842_v32, %s3684_s25  ;;  %v2843_v53 = vmax.f32 %v2217_v28, 0.0 }
 0x634   : > { %2463 = vmatmul.mubr.bf16.gmra.mrb[68].mxu0 %v2280_v44  ;;  %v3589_v44 = vpop.eup %3588 }
 0x635   : > { %v2220_v8 = vpop.f32.mrb[56].mxu1  ;;  %2470 = vmatprep.mubr.bf16.mxu0 %v3583_v40  ;;  %v1048_v40 = vmul.bf16 1069105081, %v1025_v26 }
 0x636   : > { %v2222_v61 = vpop.f32.mrb[57].mxu1  ;;  %v2221_v62 = vadd.f32 %v2220_v8, %v4382_v34 }
 0x637   : > { %v2223_v27 = vadd.f32 %v2222_v61, %v4377_v59  ;;  %v2224_v57 = vpop.f32.mrb[58].mxu1  ;;  %2895 = vrot.lane.b32.xlu1 %v2843_v53, %s3684_s25  ;;  %3592 = vpow.bf16 %v1048_v40 }
 0x638   : > { %v2225_v48 = vadd.f32 %v2224_v57, %v4382_v34  ;;  %v2226_v2 = vpop.f32.mrb[59].mxu1 }
 0x639   : > { %v2844_v29 = vmax.f32 %v2223_v27, 0.0  ;;  %v2227_v1 = vadd.f32 %v2226_v2, %v4377_v59 }
 0x63a   : > { %v2281_v3 = vpack.c.bf16 %v2225_v48, %v2221_v62 }
 0x63b   : > { %v2845_v24 = vmax.f32 %v2227_v1, 0.0  ;;  %2897 = vrot.lane.b32.xlu0 %v2844_v29, %s3684_s25 }
 0x63c   : > { %2471 = vmatmul.mubr.bf16.gmra.mrb[72].mxu0 %v2281_v3  ;;  %v3591_v37 = vpop.eup %3590 }
 0x63d   : > { %v2230_v23 = vpop.f32.mrb[60].mxu1  ;;  %2899 = vrot.lane.b32.xlu1 %v2845_v24, %s3684_s25  ;;  %2478 = vmatprep.mubr.bf16.mxu0 %v3585_v17 }
 0x63e   : > { %v2232_v35 = vpop.f32.mrb[61].mxu1  ;;  %v2231_v46 = vadd.f32 %v2230_v23, %v4382_v34 }
 0x63f   : > { %v2233_v5 = vadd.f32 %v2232_v35, %v4377_v59  ;;  %v2234_v43 = vpop.f32.mrb[62].mxu1 }
 0x640   : > { %v2235_v12 = vadd.f32 %v2234_v43, %v4382_v34  ;;  %v2236_v55 = vpop.f32.mrb[63].mxu1 }
 0x641   : > { %v2846_v50 = vmax.f32 %v2233_v5, 0.0  ;;  %v2237_v10 = vadd.f32 %v2236_v55, %v4377_v59  ;;  %v3497_v55 = vld [vmem:[%s4590_s15 + $0x18] sm:$0xff]  }
 0x642   : > { %v2282_v7 = vpack.c.bf16 %v2235_v12, %v2231_v46  ;;  %v3593_v24 = vpop.eup %3592  ;;  %v3494_v12 = vld [vmem:[%s4590_s15] sm:$0xff]  }
 0x643   : > { %v2847_v51 = vmax.f32 %v2237_v10, 0.0  ;;  %2901 = vrot.lane.b32.xlu0 %v2846_v50, %s3684_s25  ;;  %3387 = vmatprep.subr.bf16.mxu1 %v3494_v12 }
 0x644   : > { %2479 = vmatmul.mubr.bf16.gmra.mrb[76].mxu0 %v2282_v7  ;;  %3363 = vmatprep.subr.bf16.mxu0 %v3494_v12 }
 0x645   : > { %v2240_v18 = vpop.f32.mrb[64].mxu1  ;;  %2903 = vrot.lane.b32.xlu1 %v2847_v51, %s3684_s25  ;;  %2486 = vmatprep.mubr.bf16.mxu0 %v3587_v13 }
 0x646   : > { %v2242_v19 = vpop.f32.mrb[65].mxu1  ;;  %v2241_v21 = vadd.f32 %v2240_v18, %v4382_v34  ;;  %3391 = vmatpush3.bf16.msra.mxu1 %v3494_v12  ;;  %3364 = vmatpush3.bf16.msra.mxu0 %v3494_v12 }
 0x647   : > { %v2243_v63 = vadd.f32 %v2242_v19, %v4377_v59  ;;  %v2244_v41 = vpop.f32.mrb[66].mxu1 }
 0x648   : > { %v2245_v45 = vadd.f32 %v2244_v41, %v4382_v34  ;;  %v2246_v56 = vpop.f32.mrb[67].mxu1 }
 0x649   : > { %v2848_v32 = vmax.f32 %v2243_v63, 0.0  ;;  %v2247_v28 = vadd.f32 %v2246_v56, %v4377_v59 }
 0x64a   : > { %v2283_v38 = vpack.c.bf16 %v2245_v45, %v2241_v21 }
 0x64b   : > { %v2849_v30 = vmax.f32 %v2247_v28, 0.0  ;;  %2905 = vrot.lane.b32.xlu0 %v2848_v32, %s3684_s25 }
 0x64c   : > { %2487 = vmatmul.mubr.bf16.gmra.mrb[80].mxu0 %v2283_v38 }
 0x64d   : > { %v2250_v39 = vpop.f32.mrb[68].mxu1  ;;  %2907 = vrot.lane.b32.xlu1 %v2849_v30, %s3684_s25  ;;  %2494 = vmatprep.mubr.bf16.mxu0 %v3589_v44 }
 0x64e   : > { %v2252_v52 = vpop.f32.mrb[69].mxu1  ;;  %v2251_v8 = vadd.f32 %v2250_v39, %v4382_v34 }
 0x64f   : > { %v2253_v58 = vadd.f32 %v2252_v52, %v4377_v59  ;;  %v2254_v53 = vpop.f32.mrb[70].mxu1 }
 0x650   : > { %v2255_v31 = vadd.f32 %v2254_v53, %v4382_v34  ;;  %v2256_v25 = vpop.f32.mrb[71].mxu1 }
 0x651   : > { %v2850_v61 = vmax.f32 %v2253_v58, 0.0  ;;  %v2257_v54 = vadd.f32 %v2256_v25, %v4377_v59 }
 0x652   : > { %v2284_v27 = vpack.c.bf16 %v2255_v31, %v2251_v8 }
 0x653   : > { %v2851_v57 = vmax.f32 %v2257_v54, 0.0  ;;  %2909 = vrot.lane.b32.xlu0 %v2850_v61, %s3684_s25 }
 0x654   : > { %2495 = vmatmul.mubr.bf16.gmra.mrb[84].mxu0 %v2284_v27 }
 0x655   : > { %v2260_v60 = vpop.f32.mrb[72].mxu1  ;;  %2911 = vrot.lane.b32.xlu1 %v2851_v57, %s3684_s25  ;;  %2502 = vmatprep.mubr.bf16.mxu0 %v3591_v37 }
 0x656   : > { %v2262_v62 = vpop.f32.mrb[73].mxu1  ;;  %v2261_v0 = vadd.f32 %v2260_v60, %v4382_v34 }
 0x657   : > { %v2263_v48 = vadd.f32 %v2262_v62, %v4377_v59  ;;  %v2264_v2 = vpop.f32.mrb[74].mxu1 }
 0x658   : > { %v2265_v11 = vadd.f32 %v2264_v2, %v4382_v34  ;;  %v2266_v29 = vpop.f32.mrb[75].mxu1 }
 0x659   : > { %v2852_v1 = vmax.f32 %v2263_v48, 0.0  ;;  %v2267_v3 = vadd.f32 %v2266_v29, %v4377_v59 }
 0x65a   : > { %v2285_v47 = vpack.c.bf16 %v2265_v11, %v2261_v0 }
 0x65b   : > { %v2853_v36 = vmax.f32 %v2267_v3, 0.0  ;;  %2913 = vrot.lane.b32.xlu0 %v2852_v1, %s3684_s25 }
 0x65c   : > { %2503 = vmatmul.mubr.bf16.gmra.mrb[88].mxu0 %v2285_v47 }
 0x65d   : > { %v2270_v17 = vpop.f32.mrb[76].mxu1  ;;  %2915 = vrot.lane.b32.xlu1 %v2853_v36, %s3684_s25  ;;  %2510 = vmatprep.mubr.bf16.mxu0 %v3593_v24 }
 0x65e   : > { %v2272_v9 = vpop.f32.mrb[77].mxu1  ;;  %v2271_v23 = vadd.f32 %v2270_v17, %v4382_v34 }
 0x65f   : > { %v2273_v42 = vadd.f32 %v2272_v9, %v4377_v59  ;;  %v2274_v22 = vpop.f32.mrb[78].mxu1 }
 0x660   : > { %v2275_v35 = vadd.f32 %v2274_v22, %v4382_v34  ;;  %v2276_v33 = vpop.f32.mrb[79].mxu1  ;;  %v3495_v34 = vld [vmem:[%s4590_s15 + $0x8] sm:$0xff]  }
 0x661   : > { %v2854_v4 = vmax.f32 %v2273_v42, 0.0  ;;  %v2277_v5 = vadd.f32 %v2276_v33, %v4377_v59  ;;  %3388 = vmatprep.subr.bf16.mxu1 %v3495_v34  ;;  %3365 = vmatprep.subr.bf16.mxu0 %v3495_v34  ;;  %v3496_v59 = vld [vmem:[%s4590_s15 + $0x10] sm:$0xff]  }
 0x662   : > { %v2286_v43 = vpack.c.bf16 %v2275_v35, %v2271_v23  ;;  %3392 = vmatpush3.bf16.msra.mxu1 %v3495_v34  ;;  %3366 = vmatpush3.bf16.msra.mxu0 %v3495_v34 }
 0x663   : > { %v2855_v46 = vmax.f32 %v2277_v5, 0.0  ;;  %2917 = vrot.lane.b32.xlu0 %v2854_v4, %s3684_s25  ;;  %3367 = vmatprep.subr.bf16.mxu0 %v3496_v59 }
 0x664   : > { %2511 = vmatmul.mubr.bf16.gmra.mrb[92].mxu0 %v2286_v43  ;;  %3389 = vmatprep.subr.bf16.mxu1 %v3496_v59 }
 0x665   : > { %2919 = vrot.lane.b32.xlu1 %v2855_v46, %s3684_s25 }
 0x666   : > { %3368 = vmatpush3.bf16.msra.mxu0 %v3496_v59  ;;  %3393 = vmatpush3.bf16.msra.mxu1 %v3496_v59 }
 0x667   : > { %3369 = vmatprep.subr.bf16.mxu0 %v3497_v55  ;;  %3390 = vmatprep.subr.bf16.mxu1 %v3497_v55 }
 0x66a   : > { %3370 = vmatpush3.bf16.msra.mxu0 %v3497_v55  ;;  %3394 = vmatpush3.bf16.msra.mxu1 %v3497_v55 }
 0x6ff   : > { %v3207_v6 = vpop.f32.mrb[64].mxu0 }
 0x700   : > { %v3208_v50 = vpop.f32.mrb[65].mxu0 }
 0x701   : > { %v3209_v10 = vadd.f32 %v3208_v50, %v3207_v6  ;;  %v3210_v7 = vpop.f32.mrb[66].mxu0 }
 0x702   : > { %v3211_v13 = vpop.f32.mrb[67].mxu0 }
 0x703   : > { %v2457_v16 = vadd.f32 %v3209_v10, %v4454_v14  ;;  %v3212_v51 = vadd.f32 %v3211_v13, %v3210_v7 }
 0x705   : > { %v2519_v49 = vmul.f32 %v2457_v16, %v2457_v16  ;;  %v2460_v15 = vadd.f32 %v3212_v51, %v4454_v14 }
 0x707   : > { %v2520_v18 = vmul.f32 %v2460_v15, %v2460_v15  ;;  %v3213_v19 = vpop.f32.mrb[68].mxu0  ;;  %v2535_v63 = vmul.f32 -0.5, %v2519_v49 }
 0x708   : > { %v3214_v20 = vpop.f32.mrb[69].mxu0 }
 0x709   : > { %v2536_v41 = vmul.f32 -0.5, %v2520_v18  ;;  %v3215_v21 = vadd.f32 %v3214_v20, %v3213_v19  ;;  %v3216_v45 = vpop.f32.mrb[70].mxu0 }
 0x70a   : > { %v3217_v56 = vpop.f32.mrb[71].mxu0 }
 0x70b   : > { %v2551_v26 = vpack.c.bf16 %v2536_v41, %v2535_v63  ;;  %v2465_v32 = vadd.f32 %v3215_v21, %v4454_v14  ;;  %v3218_v28 = vadd.f32 %v3217_v56, %v3216_v45 }
 0x70d   : > { %v2560_v38 = vmul.bf16 1069105081, %v2551_v26  ;;  %v2521_v44 = vmul.f32 %v2465_v32, %v2465_v32  ;;  %v2468_v30 = vadd.f32 %v3218_v28, %v4454_v14 }
 0x70f   : > { %3594 = vpow.bf16 %v2560_v38  ;;  %v2522_v40 = vmul.f32 %v2468_v30, %v2468_v30  ;;  %v3219_v39 = vpop.f32.mrb[72].mxu0  ;;  %v2537_v58 = vmul.f32 -0.5, %v2521_v44 }
 0x710   : > { %v3220_v52 = vpop.f32.mrb[73].mxu0 }
 0x711   : > { %v2538_v53 = vmul.f32 -0.5, %v2522_v40  ;;  %v3221_v8 = vadd.f32 %v3220_v52, %v3219_v39  ;;  %v3222_v31 = vpop.f32.mrb[74].mxu0 }
 0x712   : > { %v3223_v25 = vpop.f32.mrb[75].mxu0 }
 0x713   : > { %v2552_v61 = vpack.c.bf16 %v2538_v53, %v2537_v58  ;;  %v2473_v54 = vadd.f32 %v3221_v8, %v4454_v14  ;;  %v3224_v27 = vadd.f32 %v3223_v25, %v3222_v31 }
 0x715   : > { %v2563_v57 = vmul.bf16 1069105081, %v2552_v61  ;;  %v2523_v37 = vmul.f32 %v2473_v54, %v2473_v54  ;;  %v2476_v60 = vadd.f32 %v3224_v27, %v4454_v14 }
 0x717   : > { %3596 = vpow.bf16 %v2563_v57  ;;  %v2524_v62 = vmul.f32 %v2476_v60, %v2476_v60  ;;  %v3225_v48 = vpop.f32.mrb[76].mxu0  ;;  %v2539_v0 = vmul.f32 -0.5, %v2523_v37 }
 0x718   : > { %v3226_v2 = vpop.f32.mrb[77].mxu0 }
 0x719   : > { %v2540_v11 = vmul.f32 -0.5, %v2524_v62  ;;  %v3227_v29 = vadd.f32 %v3226_v2, %v3225_v48  ;;  %v3228_v1 = vpop.f32.mrb[78].mxu0 }
 0x71a   : > { %v3595_v3 = vpop.eup %3594  ;;  %v3229_v47 = vpop.f32.mrb[79].mxu0 }
 0x71b   : > { %v2553_v36 = vpack.c.bf16 %v2540_v11, %v2539_v0  ;;  %v2481_v24 = vadd.f32 %v3227_v29, %v4454_v14  ;;  %v3230_v17 = vadd.f32 %v3229_v47, %v3228_v1  ;;  %3371 = vmatprep.mubr.msk.bf16.mxu0 %vm2622_vm1, %v3595_v3 }
 0x71d   : > { %v2566_v9 = vmul.bf16 1069105081, %v2553_v36  ;;  %v2525_v42 = vmul.f32 %v2481_v24, %v2481_v24  ;;  %v2484_v22 = vadd.f32 %v3230_v17, %v4454_v14 }
 0x71f   : > { %3598 = vpow.bf16 %v2566_v9  ;;  %v2526_v23 = vmul.f32 %v2484_v22, %v2484_v22  ;;  %v3231_v35 = vpop.f32.mrb[80].mxu0  ;;  %v2541_v4 = vmul.f32 -0.5, %v2525_v42 }
 0x720   : > { %v3232_v33 = vpop.f32.mrb[81].mxu0 }
 0x721   : > { %v2542_v5 = vmul.f32 -0.5, %v2526_v23  ;;  %v3233_v43 = vadd.f32 %v3232_v33, %v3231_v35  ;;  %v3234_v46 = vpop.f32.mrb[82].mxu0 }
 0x722   : > { %v3597_v12 = vpop.eup %3596  ;;  %v3235_v34 = vpop.f32.mrb[83].mxu0 }
 0x723   : > { %v2554_v59 = vpack.c.bf16 %v2542_v5, %v2541_v4  ;;  %v2489_v55 = vadd.f32 %v3233_v43, %v4454_v14  ;;  %v3236_v6 = vadd.f32 %v3235_v34, %v3234_v46  ;;  %3372 = vmatmul.mubr.msk.bf16.vlgmr.msra.gmra.mrb[96].mxu0 %vm2622_vm1, %v3597_v12 }
 0x725   : > { %v2569_v50 = vmul.bf16 1069105081, %v2554_v59  ;;  %v2527_v10 = vmul.f32 %v2489_v55, %v2489_v55  ;;  %v2492_v7 = vadd.f32 %v3236_v6, %v4454_v14 }
 0x727   : > { %3600 = vpow.bf16 %v2569_v50  ;;  %v2528_v13 = vmul.f32 %v2492_v7, %v2492_v7  ;;  %v3237_v16 = vpop.f32.mrb[84].mxu0  ;;  %v2543_v49 = vmul.f32 -0.5, %v2527_v10 }
 0x728   : > { %v3238_v51 = vpop.f32.mrb[85].mxu0 }
 0x729   : > { %v2544_v15 = vmul.f32 -0.5, %v2528_v13  ;;  %v3239_v18 = vadd.f32 %v3238_v51, %v3237_v16  ;;  %v3240_v19 = vpop.f32.mrb[86].mxu0 }
 0x72a   : > { %v3599_v20 = vpop.eup %3598  ;;  %v3241_v63 = vpop.f32.mrb[87].mxu0 }
 0x72b   : > { %v2555_v41 = vpack.c.bf16 %v2544_v15, %v2543_v49  ;;  %v2497_v21 = vadd.f32 %v3239_v18, %v4454_v14  ;;  %v3242_v45 = vadd.f32 %v3241_v63, %v3240_v19  ;;  %3375 = vmatprep.mubr.msk.bf16.mxu1 %vm2622_vm1, %v3599_v20 }
 0x72d   : > { %v2572_v56 = vmul.bf16 1069105081, %v2555_v41  ;;  %v2529_v26 = vmul.f32 %v2497_v21, %v2497_v21  ;;  %v2500_v32 = vadd.f32 %v3242_v45, %v4454_v14 }
 0x72f   : > { %3602 = vpow.bf16 %v2572_v56  ;;  %v2530_v28 = vmul.f32 %v2500_v32, %v2500_v32  ;;  %v3243_v38 = vpop.f32.mrb[88].mxu0  ;;  %v2545_v30 = vmul.f32 -0.5, %v2529_v26 }
 0x730   : > { %v3244_v44 = vpop.f32.mrb[89].mxu0 }
 0x731   : > { %v2546_v40 = vmul.f32 -0.5, %v2530_v28  ;;  %v3245_v39 = vadd.f32 %v3244_v44, %v3243_v38  ;;  %v3246_v52 = vpop.f32.mrb[90].mxu0 }
 0x732   : > { %v3601_v58 = vpop.eup %3600  ;;  %v3247_v53 = vpop.f32.mrb[91].mxu0 }
 0x733   : > { %v2556_v8 = vpack.c.bf16 %v2546_v40, %v2545_v30  ;;  %v2505_v31 = vadd.f32 %v3245_v39, %v4454_v14  ;;  %v3248_v25 = vadd.f32 %v3247_v53, %v3246_v52  ;;  %3376 = vmatmul.mubr.msk.bf16.vlgmr.msra.gmra.mrb[80].mxu1 %vm2622_vm1, %v3601_v58  ;;  %v2892_v39 = vpop.permute.xlu1 %2891 }
 0x735   : > { %v2575_v61 = vmul.bf16 1069105081, %v2556_v8  ;;  %v2531_v54 = vmul.f32 %v2505_v31, %v2505_v31  ;;  %v2508_v27 = vadd.f32 %v3248_v25, %v4454_v14 }
 0x737   : > { %3604 = vpow.bf16 %v2575_v61  ;;  %v2532_v57 = vmul.f32 %v2508_v27, %v2508_v27  ;;  %v3249_v37 = vpop.f32.mrb[92].mxu0  ;;  %v2547_v62 = vmul.f32 -0.5, %v2531_v54  ;;  %v2894_v53 = vpop.permute.xlu1 %2893 }
 0x738   : > { %v3250_v60 = vpop.f32.mrb[93].mxu0  ;;  %v2890_v61 = vpop.permute.xlu0 %2889 }
 0x739   : > { %v2548_v48 = vmul.f32 -0.5, %v2532_v57  ;;  %v3251_v2 = vadd.f32 %v3250_v60, %v3249_v37  ;;  %v3252_v0 = vpop.f32.mrb[94].mxu0 }
 0x73a   : > { %v3603_v11 = vpop.eup %3602  ;;  %v3253_v29 = vpop.f32.mrb[95].mxu0 }
 0x73b   : > { %v2557_v1 = vpack.c.bf16 %v2548_v48, %v2547_v62  ;;  %v2513_v3 = vadd.f32 %v3251_v2, %v4454_v14  ;;  %v3254_v47 = vadd.f32 %v3253_v29, %v3252_v0  ;;  %3379 = vmatprep.mubr.msk.bf16.mxu1 %vm2622_vm1, %v3603_v11  ;;  %v2896_v27 = vpop.permute.xlu1 %2895 }
 0x73d   : > { %v2578_v36 = vmul.bf16 1069105081, %v2557_v1  ;;  %v2533_v24 = vmul.f32 %v2513_v3, %v2513_v3  ;;  %v2516_v17 = vadd.f32 %v3254_v47, %v4454_v14  ;;  %v4483_v14 = vld [vmem:[%s4591_s16] ss:$0 sm:$0xff] }
 0x73f   : > { %3606 = vpow.bf16 %v2578_v36  ;;  %v2534_v9 = vmul.f32 %v2516_v17, %v2516_v17  ;;  %v2549_v42 = vmul.f32 -0.5, %v2533_v24 }
 0x741   : > { %v2550_v22 = vmul.f32 -0.5, %v2534_v9 }
 0x742   : > { %v3605_v23 = vpop.eup %3604 }
 0x743   : > { %v2558_v35 = vpack.c.bf16 %v2550_v22, %v2549_v42  ;;  %3380 = vmatmul.mubr.msk.bf16.gmra.mrb[84].mxu1 %vm2622_vm1, %v3605_v23 }
 0x745   : > { %v2581_v33 = vmul.bf16 1069105081, %v2558_v35 }
 0x747   : > { %3608 = vpow.bf16 %v2581_v33  ;;  %v2898_v33 = vpop.permute.xlu0 %2897 }
 0x74a   : > { %v3607_v4 = vpop.eup %3606 }
 0x74b   : > { %3383 = vmatprep.mubr.msk.bf16.mxu1 %vm2622_vm1, %v3607_v4  ;;  %v2900_v4 = vpop.permute.xlu1 %2899 }
 0x752   : > { %v3609_v5 = vpop.eup %3608 }
 0x753   : > { %3384 = vmatmul.mubr.msk.bf16.gmra.mrb[88].mxu1 %vm2622_vm1, %v3609_v5 }
 0x7f6   : > { %v3373_v43 = vpop.f32.mrb[96].mxu0 }
 0x7f7   : > { %v2690_v46 = vadd.f32 %v3373_v43, %v4483_v14  ;;  %v2681_v12 = vpop.f32.mrb[97].mxu0 }
 0x7f8   : > { %v2682_v34 = vadd.f32 %v4483_v14, %v2681_v12  ;;  %v3374_v59 = vpop.f32.mrb[98].mxu0 }
 0x7f9   : > { %v3127_v55 = vmul.f32 -1.442695, %v2690_v46  ;;  %v2693_v6 = vadd.f32 %v3374_v59, %v4483_v14  ;;  %v2684_v50 = vpop.f32.mrb[99].mxu0  ;;  %v2902_v46 = vpop.permute.xlu0 %2901 }
 0x7fa   : > { %v3125_v10 = vmul.f32 -1.442695, %v2682_v34  ;;  %v2685_v7 = vadd.f32 %v4483_v14, %v2684_v50  ;;  %v2904_v59 = vpop.permute.xlu1 %2903 }
 0x7fb   : > { %3610 = vpow2.f32 %v3127_v55  ;;  %v3128_v13 = vmul.f32 -1.442695, %v2693_v6 }
 0x7fc   : > { %3612 = vpow2.f32 %v3125_v10  ;;  %v3126_v16 = vmul.f32 -1.442695, %v2685_v7 }
 0x7fd   : > { %3614 = vpow2.f32 %v3128_v13 }
 0x7fe   : > { %3616 = vpow2.f32 %v3126_v16 }
 0x805   : > { %v3611_v51 = vpop.eup %3610 }
 0x806   : > { %v3613_v49 = vpop.eup %3612  ;;  %v2794_v15 = vadd.f32 1.0, %v3611_v51  ;;  %v3377_v18 = vpop.f32.mrb[80].mxu1 }
 0x807   : > { %v3615_v19 = vpop.eup %3614  ;;  %v2792_v20 = vadd.f32 1.0, %v3613_v49  ;;  %v2706_v63 = vadd.f32 %v3377_v18, %v4483_v14  ;;  %v2697_v41 = vpop.f32.mrb[81].mxu1 }
 0x808   : > { %v3617_v21 = vpop.eup %3616  ;;  %3618 = vrcp.f32 %v2794_v15  ;;  %v2795_v45 = vadd.f32 1.0, %v3615_v19  ;;  %v2698_v56 = vadd.f32 %v4483_v14, %v2697_v41  ;;  %v3378_v26 = vpop.f32.mrb[82].mxu1 }
 0x809   : > { %3620 = vrcp.f32 %v2792_v20  ;;  %v2793_v32 = vadd.f32 1.0, %v3617_v21  ;;  %v3131_v28 = vmul.f32 -1.442695, %v2706_v63  ;;  %v2709_v38 = vadd.f32 %v3378_v26, %v4483_v14  ;;  %v2700_v44 = vpop.f32.mrb[83].mxu1 }
 0x80a   : > { %3622 = vrcp.f32 %v2795_v45  ;;  %v3129_v30 = vmul.f32 -1.442695, %v2698_v56  ;;  %v2701_v40 = vadd.f32 %v4483_v14, %v2700_v44 }
 0x80b   : > { %3624 = vrcp.f32 %v2793_v32  ;;  %v3132_v52 = vmul.f32 -1.442695, %v2709_v38 }
 0x80c   : > { %3626 = vpow2.f32 %v3131_v28  ;;  %v3130_v58 = vmul.f32 -1.442695, %v2701_v40  ;;  %v2906_v28 = vpop.permute.xlu0 %2905 }
 0x80d   : > { %3628 = vpow2.f32 %v3129_v30 }
 0x80e   : > { %3630 = vpow2.f32 %v3132_v52 }
 0x80f   : > { %3632 = vpow2.f32 %v3130_v58 }
 0x810   : > { %v2910_v30 = vpop.permute.xlu0 %2909 }
 0x812   : > { %v3619_v8 = vpop.eup %3618 }
 0x813   : > { %v3621_v31 = vpop.eup %3620  ;;  %2859 = vst.msk [vmem:[%s4498_s0 + $0x10] sm:$0xff] %vm2856_vm2, %v3619_v8 }
 0x814   : > { %v3623_v25 = vpop.eup %3622  ;;  %2940 = vst.msk [vmem:[%s4498_s0 + $0x10] sm:$0xff] %vm2937_vm3, %v2894_v53 }
 0x815   : > { %2857 = vst.msk [vmem:[%s4498_s0] sm:$0xff] %vm2856_vm2, %v3621_v31  ;;  %v3625_v54 = vpop.eup %3624  ;;  %2860 = vst.msk [vmem:[%s4498_s0 + $0x18] sm:$0xff] %vm2856_vm2, %v3623_v25 }
 0x816   : > { %2938 = vst.msk [vmem:[%s4498_s0] sm:$0xff] %vm2937_vm3, %v2890_v61  ;;  %v3627_v57 = vpop.eup %3626  ;;  %2941 = vst.msk [vmem:[%s4498_s0 + $0x18] sm:$0xff] %vm2937_vm3, %v2896_v27  ;;  %v3381_v37 = vpop.f32.mrb[84].mxu1 }
 0x817   : > { %2858 = vst.msk [vmem:[%s4498_s0 + $0x8] sm:$0xff] %vm2856_vm2, %v3625_v54  ;;  %v3629_v60 = vpop.eup %3628  ;;  %v2798_v62 = vadd.f32 1.0, %v3627_v57  ;;  %v2722_v48 = vadd.f32 %v3381_v37, %v4483_v14  ;;  %v2713_v2 = vpop.f32.mrb[85].mxu1 }
 0x818   : > { %2939 = vst.msk [vmem:[%s4498_s0 + $0x8] sm:$0xff] %vm2937_vm3, %v2892_v39  ;;  %v3631_v0 = vpop.eup %3630  ;;  %v2796_v11 = vadd.f32 1.0, %v3629_v60  ;;  %v2714_v29 = vadd.f32 %v4483_v14, %v2713_v2  ;;  %v3382_v1 = vpop.f32.mrb[86].mxu1 }
 0x819   : > { %v3633_v3 = vpop.eup %3632  ;;  %3634 = vrcp.f32 %v2798_v62  ;;  %v2799_v47 = vadd.f32 1.0, %v3631_v0  ;;  %v3135_v36 = vmul.f32 -1.442695, %v2722_v48  ;;  %v2725_v24 = vadd.f32 %v3382_v1, %v4483_v14  ;;  %v2716_v17 = vpop.f32.mrb[87].mxu1 }
 0x81a   : > { %3636 = vrcp.f32 %v2796_v11  ;;  %v2797_v9 = vadd.f32 1.0, %v3633_v3  ;;  %v3133_v42 = vmul.f32 -1.442695, %v2714_v29  ;;  %v2717_v22 = vadd.f32 %v4483_v14, %v2716_v17  ;;  %v2914_v57 = vpop.permute.xlu0 %2913 }
 0x81b   : > { %3638 = vrcp.f32 %v2799_v47  ;;  %v3136_v23 = vmul.f32 -1.442695, %v2725_v24 }
 0x81c   : > { %3640 = vrcp.f32 %v2797_v9  ;;  %v3134_v35 = vmul.f32 -1.442695, %v2717_v22 }
 0x81d   : > { %3642 = vpow2.f32 %v3135_v36 }
 0x81e   : > { %3644 = vpow2.f32 %v3133_v42  ;;  %v2918_v48 = vpop.permute.xlu0 %2917 }
 0x81f   : > { %3646 = vpow2.f32 %v3136_v23 }
 0x820   : > { %3648 = vpow2.f32 %v3134_v35 }
 0x823   : > { %v3635_v5 = vpop.eup %3634 }
 0x824   : > { %v3637_v43 = vpop.eup %3636  ;;  %2863 = vst.msk [vmem:[%s4498_s0 + $0x30] sm:$0xff] %vm2856_vm2, %v3635_v5 }
 0x825   : > { %v3639_v12 = vpop.eup %3638  ;;  %2944 = vst.msk [vmem:[%s4498_s0 + $0x30] sm:$0xff] %vm2937_vm3, %v2902_v46 }
 0x826   : > { %2861 = vst.msk [vmem:[%s4498_s0 + $0x20] sm:$0xff] %vm2856_vm2, %v3637_v43  ;;  %v3641_v34 = vpop.eup %3640  ;;  %2864 = vst.msk [vmem:[%s4498_s0 + $0x38] sm:$0xff] %vm2856_vm2, %v3639_v12  ;;  %v3385_v55 = vpop.f32.mrb[88].mxu1 }
 0x827   : > { %2942 = vst.msk [vmem:[%s4498_s0 + $0x20] sm:$0xff] %vm2937_vm3, %v2898_v33  ;;  %v3643_v6 = vpop.eup %3642  ;;  %2945 = vst.msk [vmem:[%s4498_s0 + $0x38] sm:$0xff] %vm2937_vm3, %v2904_v59  ;;  %v2738_v50 = vadd.f32 %v3385_v55, %v4483_v14  ;;  %v2729_v10 = vpop.f32.mrb[89].mxu1 }
 0x828   : > { %2862 = vst.msk [vmem:[%s4498_s0 + $0x28] sm:$0xff] %vm2856_vm2, %v3641_v34  ;;  %v3645_v7 = vpop.eup %3644  ;;  %v2802_v13 = vadd.f32 1.0, %v3643_v6  ;;  %v2730_v16 = vadd.f32 %v4483_v14, %v2729_v10  ;;  %v3386_v51 = vpop.f32.mrb[90].mxu1 }
 0x829   : > { %2943 = vst.msk [vmem:[%s4498_s0 + $0x28] sm:$0xff] %vm2937_vm3, %v2900_v4  ;;  %v3647_v49 = vpop.eup %3646  ;;  %v2800_v15 = vadd.f32 1.0, %v3645_v7  ;;  %v2741_v18 = vadd.f32 %v3386_v51, %v4483_v14  ;;  %v2732_v19 = vpop.f32.mrb[91].mxu1  ;;  %v3139_v41 = vmul.f32 -1.442695, %v2738_v50 }
 0x82a   : > { %v3649_v20 = vpop.eup %3648  ;;  %3650 = vrcp.f32 %v2802_v13  ;;  %v2803_v63 = vadd.f32 1.0, %v3647_v49  ;;  %v2733_v21 = vadd.f32 %v4483_v14, %v2732_v19  ;;  %v3137_v56 = vmul.f32 -1.442695, %v2730_v16  ;;  %v2908_v14 = vpop.permute.xlu1 %2907 }
 0x82b   : > { %3652 = vrcp.f32 %v2800_v15  ;;  %v2801_v45 = vadd.f32 1.0, %v3649_v20  ;;  %v3140_v26 = vmul.f32 -1.442695, %v2741_v18 }
 0x82c   : > { %3654 = vrcp.f32 %v2803_v63  ;;  %v3138_v32 = vmul.f32 -1.442695, %v2733_v21 }
 0x82d   : > { %3656 = vrcp.f32 %v2801_v45 }
 0x82e   : > { %3658 = vpow2.f32 %v3139_v41  ;;  %v2912_v52 = vpop.permute.xlu1 %2911 }
 0x82f   : > { %3660 = vpow2.f32 %v3137_v56 }
 0x830   : > { %3662 = vpow2.f32 %v3140_v26 }
 0x831   : > { %3664 = vpow2.f32 %v3138_v32 }
 0x832   : > { %v2916_v37 = vpop.permute.xlu1 %2915 }
 0x834   : > { %v3651_v38 = vpop.eup %3650 }
 0x835   : > { %v3653_v44 = vpop.eup %3652  ;;  %2867 = vst.msk [vmem:[%s4498_s0 + $0x50] sm:$0xff] %vm2856_vm2, %v3651_v38 }
 0x836   : > { %v3655_v40 = vpop.eup %3654  ;;  %2948 = vst.msk [vmem:[%s4498_s0 + $0x50] sm:$0xff] %vm2937_vm3, %v2910_v30  ;;  %v2920_v11 = vpop.permute.xlu1 %2919 }
 0x837   : > { %2865 = vst.msk [vmem:[%s4498_s0 + $0x40] sm:$0xff] %vm2856_vm2, %v3653_v44  ;;  %v3657_v39 = vpop.eup %3656  ;;  %2868 = vst.msk [vmem:[%s4498_s0 + $0x58] sm:$0xff] %vm2856_vm2, %v3655_v40 }
 0x838   : > { %2946 = vst.msk [vmem:[%s4498_s0 + $0x40] sm:$0xff] %vm2937_vm3, %v2906_v28  ;;  %v3659_v58 = vpop.eup %3658  ;;  %2949 = vst.msk [vmem:[%s4498_s0 + $0x58] sm:$0xff] %vm2937_vm3, %v2912_v52 }
 0x839   : > { %2866 = vst.msk [vmem:[%s4498_s0 + $0x48] sm:$0xff] %vm2856_vm2, %v3657_v39  ;;  %v3661_v53 = vpop.eup %3660  ;;  %v2806_v8 = vadd.f32 1.0, %v3659_v58 }
 0x83a   : > { %2947 = vst.msk [vmem:[%s4498_s0 + $0x48] sm:$0xff] %vm2937_vm3, %v2908_v14  ;;  %v3663_v31 = vpop.eup %3662  ;;  %v2804_v25 = vadd.f32 1.0, %v3661_v53 }
 0x83b   : > { %v3665_v61 = vpop.eup %3664  ;;  %3666 = vrcp.f32 %v2806_v8  ;;  %v2807_v54 = vadd.f32 1.0, %v3663_v31 }
 0x83c   : > { %3668 = vrcp.f32 %v2804_v25  ;;  %v2805_v27 = vadd.f32 1.0, %v3665_v61 }
 0x83d   : > { %3670 = vrcp.f32 %v2807_v54 }
 0x83e   : > { %3672 = vrcp.f32 %v2805_v27 }
 0x845   : > { %v3667_v60 = vpop.eup %3666 }
 0x846   : > { %v3669_v62 = vpop.eup %3668  ;;  %2871 = vst.msk [vmem:[%s4498_s0 + $0x70] sm:$0xff] %vm2856_vm2, %v3667_v60 }
 0x847   : > { %v3671_v2 = vpop.eup %3670  ;;  %2952 = vst.msk [vmem:[%s4498_s0 + $0x70] sm:$0xff] %vm2937_vm3, %v2918_v48 }
 0x848   : > { %2869 = vst.msk [vmem:[%s4498_s0 + $0x60] sm:$0xff] %vm2856_vm2, %v3669_v62  ;;  %v3673_v0 = vpop.eup %3672  ;;  %2872 = vst.msk [vmem:[%s4498_s0 + $0x78] sm:$0xff] %vm2856_vm2, %v3671_v2 }
 0x849   : > { %2950 = vst.msk [vmem:[%s4498_s0 + $0x60] sm:$0xff] %vm2937_vm3, %v2914_v57  ;;  %2953 = vst.msk [vmem:[%s4498_s0 + $0x78] sm:$0xff] %vm2937_vm3, %v2920_v11 }
 0x84a   : > { %2870 = vst.msk [vmem:[%s4498_s0 + $0x68] sm:$0xff] %vm2856_vm2, %v3673_v0 }
 0x84b   : > { %2951 = vst.msk [vmem:[%s4498_s0 + $0x68] sm:$0xff] %vm2937_vm3, %v2916_v37 }
 0x84c PF: > { %s27_s24 = sadd.s32 1, %s3680_s24  }
 0x84d   : > { %p24_p4 = scmp.ge.s32.totalorder %s27_s24, 4  }
 0x84f   :  { %26 = sbr.rel (!%p24_p4) target bundleno = 3 (0x3), region = 118 }

</bundles_post_ra>
